<compile_context>
chip_gen: v7x
topology: tpu7x:2x2x1
jax: 0.10.0
libtpu: 0.0.40
codegen_flags: <defaults>
</compile_context>

<pallas_src>
import jax
import jax.numpy as jnp
import numpy as np
from jax.experimental import pallas as pl
from jax.experimental.pallas import tpu as pltpu

BITS_WEIGHT = 4                                   # kwargs['bits_weight']
QMAX = float(2 ** (BITS_WEIGHT - 1) - 1)          # symmetric signed range [-QMAX-1, QMAX]


def _round_up(x, m):
    return (x + m - 1) // m * m


def _fake_quant_weight(w):
    """MaxAbsStaticQuantization (symmetric, per-tensor). Tiny reduction+elementwise -> plain JAX."""
    w = w.astype(jnp.float32)
    amax = jnp.max(jnp.abs(w))
    scale = jnp.maximum(amax / QMAX, 1e-8)
    return jnp.clip(jnp.round(w / scale), -QMAX - 1.0, QMAX) * scale
    # TODO(synk): min_max / LSQ / kmeans quantization variants of the wrapper are not implemented.


def _pick_tile_oh(OH, OW, WPA, CP, OCP, KTAP, KH, KW, mm_itemsize,
                  vmem_budget_bytes=24 << 20, row_target=512):
    """Largest TILE_OH whose double-buffered working set stays under the budget.

    24 MiB budget is safe for v7x (64 MiB VMEM / 2 TCs per chip); on v5e/v6e (128 MiB) the
    budget and row_target can be raised for larger tiles.
    """
    tile = 1
    for t in range(1, OH + 1):
        rows = t * WPA
        chunk_rows = _round_up(rows + (KH - 1) * WPA + (KW - 1), 16)
        vmem = (2 * chunk_rows * CP * 4                 # double-buffered f32 activation chunk
                + 2 * t * OW * OCP * 4                  # double-buffered f32 output chunk
                + rows * KTAP * mm_itemsize             # im2col patch scratch (matmul dtype)
                + rows * OCP * 4                        # matmul result / accumulator vregs
                + KTAP * OCP * mm_itemsize + OCP * 4)   # resident weight + bias
        if vmem > vmem_budget_bytes:
            break
        tile = t
        if rows >= row_target:
            break
    return tile


def quantized_conv2d(x, weight, bias, *, tile_oh=None, matmul_dtype=jnp.bfloat16):
    """x: (N, C, H, W) NCHW; weight: (OC, C, KH, KW); bias: (OC,) or None. stride=1, 'same' padding."""
    N, C, H, W = x.shape
    OC, CW, KH, KW = weight.shape
    assert CW == C
    # TODO(synk): only the stride=1 / dilation=1 / groups=1 F.conv2d forward_functor is implemented.
    assert KH % 2 == 1 and KW % 2 == 1, "odd kernel sizes only ('same' output with padding=K//2)"
    PH, PW = KH // 2, KW // 2
    OH, OW = H, W

    HP = H + 2 * PH
    WPA = _round_up(W + 2 * PW, 8)     # padded width, mult. of 8 -> kh*WPA tap offsets sublane-aligned
    CP = _round_up(C, 8)
    OCP = _round_up(OC, 128)           # lane-dense output columns
    KTAP = KH * KW * CP                # taps folded into the contraction dimension

    mm_itemsize = jnp.dtype(matmul_dtype).itemsize
    if tile_oh is None:
        tile_oh = _pick_tile_oh(OH, OW, WPA, CP, OCP, KTAP, KH, KW, mm_itemsize)
    TILE_OH = max(1, min(int(tile_oh), OH))
    TILE_ROWS = TILE_OH * WPA                          # output rows per grid step (incl. garbage cols)
    NCHUNK = -(-OH // TILE_OH)
    OH_PAD = NCHUNK * TILE_OH
    CHUNK_ROWS = _round_up(TILE_ROWS + (KH - 1) * WPA + (KW - 1), 16)   # main rows + halo
    TOT_ROWS = (NCHUNK - 1) * TILE_ROWS + CHUNK_ROWS

    # --- weight fake-quant + fused-tap layout: (kh,kw,c)-major contraction rows, OC padded to lanes ---
    wq = _fake_quant_weight(weight)                                    # (OC, C, KH, KW) f32
    wq = jnp.transpose(wq, (2, 3, 1, 0))                               # (KH, KW, C, OC)
    wq = jnp.pad(wq, ((0, 0), (0, 0), (0, CP - C), (0, OCP - OC)))     # zero rows/lanes contribute 0
    w_fused = wq.reshape(KTAP, OCP).astype(matmul_dtype)
    # TODO(synk): int8 MXU path (weights are already 4-bit) for v5e/v6e; keep bf16 on v7x (fp8 only).

    b32 = jnp.zeros((OC,), jnp.float32) if bias is None else bias.astype(jnp.float32)
    b_pad = jnp.pad(b32, (0, OCP - OC)).reshape(1, OCP)

    # --- activations: NCHW -> padded NHWC, flattened rows, haloed row chunks (one pad pass) ---
    # Activations stay f32 in HBM/VMEM: the kw residual of the tap offsets is not aligned to bf16
    # sublane packing, so slicing happens on f32 and the cast to bf16 is done while building the
    # im2col patch (the matmul still runs on the MXU's native bf16 path).
    # TODO(synk): to also halve activation DMA, ship bf16 chunks and stage through an aligned
    # f32 VMEM scratch (or handle kw via pltpu.roll) before the tap slicing.
    xh = jnp.transpose(x, (0, 2, 3, 1)).astype(jnp.float32)            # (N, H, W, C)
    xp = jnp.pad(xh, ((0, 0), (PH, PH), (PW, WPA - W - PW), (0, CP - C)))   # (N, HP, WPA, CP)
    xflat = xp.reshape(N, HP * WPA, CP)
    xflat = jnp.pad(xflat, ((0, 0), (0, TOT_ROWS - HP * WPA), (0, 0)))
    # Halo duplication is only (KH-1)*WPA + KW-1 rows per chunk; keeps every kernel slice static.
    xch = jnp.stack(
        [xflat[:, j * TILE_ROWS:j * TILE_ROWS + CHUNK_ROWS, :] for j in range(NCHUNK)],
        axis=1)                                                        # (N, NCHUNK, CHUNK_ROWS, CP)

    def _qconv_kernel(x_ref, w_ref, b_ref, o_ref, patch_ref):
        # x_ref:     (CHUNK_ROWS, CP)    f32 activation chunk (row-flattened padded NHWC) + halo
        # w_ref:     (KTAP, OCP)         bf16 fake-quantized weight, taps folded into contraction
        # b_ref:     (1, OCP)            f32 bias
        # o_ref:     (TILE_OH, OW, OCP)  f32 output block (no padded-width garbage columns)
        # patch_ref: (TILE_ROWS, KTAP)   VMEM scratch: im2col patches for this chunk
        for t in range(KH * KW):                      # static unroll; all offsets compile-time
            kh, kw = divmod(t, KW)
            off = kh * WPA + kw                       # kh*WPA sublane-aligned (WPA % 8 == 0)
            patch_ref[:, t * CP:(t + 1) * CP] = (
                x_ref[pl.ds(off, TILE_ROWS), :].astype(matmul_dtype))
        # One MXU matmul per chunk: K = KH*KW*CP instead of KH*KW dots with K = CP; f32 accumulation.
        acc = jnp.dot(patch_ref[...], w_ref[...], preferred_element_type=jnp.float32)
        acc = acc + b_ref[...]
        # Single writeback; drop the WPA-OW garbage width columns before the store.
        for r in range(TILE_OH):
            o_ref[r, :, :] = acc[r * WPA:r * WPA + OW, :]

    out = pl.pallas_call(
        _qconv_kernel,
        out_shape=jax.ShapeDtypeStruct((N, OH_PAD, OW, OCP), jnp.float32),
        grid_spec=pltpu.PrefetchScalarGridSpec(
            num_scalar_prefetch=0,
            grid=(N, NCHUNK),
            in_specs=[
                pl.BlockSpec((None, None, CHUNK_ROWS, CP), lambda n, j: (n, j, 0, 0)),
                pl.BlockSpec((KTAP, OCP), lambda n, j: (0, 0),
                             pipeline_mode=pl.Buffered(1)),       # constant block: single buffer
                pl.BlockSpec((1, OCP), lambda n, j: (0, 0),
                             pipeline_mode=pl.Buffered(1)),
            ],
            out_specs=pl.BlockSpec((None, TILE_OH, OW, OCP), lambda n, j: (n, j, 0, 0)),
            scratch_shapes=[pltpu.VMEM((TILE_ROWS, KTAP), matmul_dtype)],
        ),
        compiler_params=pltpu.CompilerParams(
            dimension_semantics=("parallel", "parallel"),   # no cross-step state; v7x 2-TC safe
            vmem_limit_bytes=48 * 1024 * 1024,              # < v7x 64 MiB; raise on v5e/v6e for bigger tiles
        ),
    )(xch, w_fused, b_pad)

    out = out[:, :OH, :, :OC]                     # drop OH padding and OC lane padding
    # TODO(synk): keep NHWC end-to-end if the surrounding model allows; this transpose is pure glue.
    return jnp.transpose(out, (0, 3, 1, 2))       # NCHW


def _reference(x, weight, bias, matmul_dtype=None):
    """Pure-JAX reference: same fake-quant, then f32 conv2d (NCHW).  If matmul_dtype is given,
    mirror the kernel's matmul-input precision policy (inputs rounded to bf16, f32 accumulation)."""
    wq = _fake_quant_weight(weight)
    xr = x.astype(jnp.float32)
    if matmul_dtype is not None:
        wq = wq.astype(matmul_dtype).astype(jnp.float32)
        xr = xr.astype(matmul_dtype).astype(jnp.float32)
    PH, PW = weight.shape[2] // 2, weight.shape[3] // 2
    out = jax.lax.conv_general_dilated(
        xr, wq, window_strides=(1, 1), padding=((PH, PH), (PW, PW)),
        dimension_numbers=("NCHW", "OIHW", "NCHW"),
        precision=jax.lax.Precision.HIGHEST)
    b = jnp.zeros((weight.shape[0],), jnp.float32) if bias is None else bias.astype(jnp.float32)
    return out + b.reshape(1, -1, 1, 1)


if __name__ == "__main__":
    key = jax.random.PRNGKey(0)
    kx, kw, kb = jax.random.split(key, 3)

    N, C, H, W = 2, 4, 16, 16
    OC, KH, KW = 8, 3, 3

    x = jax.random.normal(kx, (N, C, H, W), dtype=jnp.float32)
    weight = jax.random.normal(kw, (OC, C, KH, KW), dtype=jnp.float32) * 0.1
    bias = jax.random.normal(kb, (OC,), dtype=jnp.float32) * 0.01

    # Multi-chunk (haloed row-chunk) path and the auto-tiled path (single chunk at this size).
    out_chunked = jax.block_until_ready(quantized_conv2d(x, weight, bias, tile_oh=8))
    out_auto = jax.block_until_ready(quantized_conv2d(x, weight, bias))

    ref_matched = _reference(x, weight, bias, matmul_dtype=jnp.bfloat16)  # same matmul-input precision
    ref_f32 = _reference(x, weight, bias)                                 # full-f32 module semantics
    for out in (out_chunked, out_auto):
        np.testing.assert_allclose(np.asarray(out), np.asarray(ref_matched), rtol=1e-4, atol=1e-4)
        np.testing.assert_allclose(np.asarray(out), np.asarray(ref_f32), rtol=3e-2, atol=3e-2)

    # TODO(synk): truck_stats moment logging, ml_logger/matplotlib plotting, kmeans/LSQ quant modes and
    # optimizer-bridge / state-dict handling are training/logging-time features, not the forward hot path.
    print("KERNEL_OK")
</pallas_src>

<mosaic_0001>
module attributes {stable_mosaic.version = 11 : i64} {
  func.func @_qconv_kernel(%arg0: i32, %arg1: i32, %arg2: memref<1x1x256x8xf32, #tpu.memory_space<vmem>>, %arg3: memref<72x128xbf16, #tpu.memory_space<vmem>>, %arg4: memref<1x128xf32, #tpu.memory_space<vmem>>, %arg5: memref<1x8x16x128xf32, #tpu.memory_space<vmem>>, %arg6: memref<192x72xbf16, #tpu.memory_space<vmem>>) attributes {dimension_semantics = [#tpu.dimension_semantics<parallel>, #tpu.dimension_semantics<parallel>], iteration_bounds = array<i64: 2, 2>, scalar_prefetch = 0 : i64, scratch_operands = 1 : i64, tpu.core_type = #tpu.core_type<tc>, window_params = [{transform_indices = @transform_0, window_bounds = array<i64: 1, 1, 256, 8>}, {pipeline_mode = #tpu.pipeline_mode<synchronous>, transform_indices = @transform_1, window_bounds = array<i64: 72, 128>}, {pipeline_mode = #tpu.pipeline_mode<synchronous>, transform_indices = @transform_2, window_bounds = array<i64: 1, 128>}, {transform_indices = @transform_3, window_bounds = array<i64: 1, 8, 16, 128>}]} {
    %c0 = arith.constant 0 : index
    %c0_0 = arith.constant 0 : index
    %c0_1 = arith.constant 0 : index
    %c0_2 = arith.constant 0 : index
    %0 = vector.load %arg2[%c0, %c0_0, %c0_1, %c0_2] : memref<1x1x256x8xf32, #tpu.memory_space<vmem>>, vector<1x1x192x8xf32>
    %1 = vector.shape_cast %0 : vector<1x1x192x8xf32> to vector<192x8xf32>
    %2 = arith.truncf %1 : vector<192x8xf32> to vector<192x8xbf16>
    %c0_3 = arith.constant 0 : index
    %c0_4 = arith.constant 0 : index
    %3 = vector.load %arg6[%c0_3, %c0_4] : memref<192x72xbf16, #tpu.memory_space<vmem>>, vector<192x8xbf16>
    tpu.vector_store %arg6[%c0_3, %c0_4], %2 {strides = array<i32>} : memref<192x72xbf16, #tpu.memory_space<vmem>>, vector<192x8xbf16>,
    %c0_5 = arith.constant 0 : index
    %c0_6 = arith.constant 0 : index
    %c1 = arith.constant 1 : index
    %c0_7 = arith.constant 0 : index
    %4 = vector.load %arg2[%c0_5, %c0_6, %c1, %c0_7] : memref<1x1x256x8xf32, #tpu.memory_space<vmem>>, vector<1x1x192x8xf32>
    %5 = vector.shape_cast %4 : vector<1x1x192x8xf32> to vector<192x8xf32>
    %6 = arith.truncf %5 : vector<192x8xf32> to vector<192x8xbf16>
    %c0_8 = arith.constant 0 : index
    %c8 = arith.constant 8 : index
    %7 = vector.load %arg6[%c0_8, %c8] : memref<192x72xbf16, #tpu.memory_space<vmem>>, vector<192x8xbf16>
    tpu.vector_store %arg6[%c0_8, %c8], %6 {strides = array<i32>} : memref<192x72xbf16, #tpu.memory_space<vmem>>, vector<192x8xbf16>,
    %c0_9 = arith.constant 0 : index
    %c0_10 = arith.constant 0 : index
    %c2 = arith.constant 2 : index
    %c0_11 = arith.constant 0 : index
    %8 = vector.load %arg2[%c0_9, %c0_10, %c2, %c0_11] : memref<1x1x256x8xf32, #tpu.memory_space<vmem>>, vector<1x1x192x8xf32>
    %9 = vector.shape_cast %8 : vector<1x1x192x8xf32> to vector<192x8xf32>
    %10 = arith.truncf %9 : vector<192x8xf32> to vector<192x8xbf16>
    %c0_12 = arith.constant 0 : index
    %c16 = arith.constant 16 : index
    %11 = vector.load %arg6[%c0_12, %c16] : memref<192x72xbf16, #tpu.memory_space<vmem>>, vector<192x8xbf16>
    tpu.vector_store %arg6[%c0_12, %c16], %10 {strides = array<i32>} : memref<192x72xbf16, #tpu.memory_space<vmem>>, vector<192x8xbf16>,
    %c0_13 = arith.constant 0 : index
    %c0_14 = arith.constant 0 : index
    %c24 = arith.constant 24 : index
    %c0_15 = arith.constant 0 : index
    %12 = vector.load %arg2[%c0_13, %c0_14, %c24, %c0_15] : memref<1x1x256x8xf32, #tpu.memory_space<vmem>>, vector<1x1x192x8xf32>
    %13 = vector.shape_cast %12 : vector<1x1x192x8xf32> to vector<192x8xf32>
    %14 = arith.truncf %13 : vector<192x8xf32> to vector<192x8xbf16>
    %c0_16 = arith.constant 0 : index
    %c24_17 = arith.constant 24 : index
    %15 = vector.load %arg6[%c0_16, %c24_17] : memref<192x72xbf16, #tpu.memory_space<vmem>>, vector<192x8xbf16>
    tpu.vector_store %arg6[%c0_16, %c24_17], %14 {strides = array<i32>} : memref<192x72xbf16, #tpu.memory_space<vmem>>, vector<192x8xbf16>,
    %c0_18 = arith.constant 0 : index
    %c0_19 = arith.constant 0 : index
    %c25 = arith.constant 25 : index
    %c0_20 = arith.constant 0 : index
    %16 = vector.load %arg2[%c0_18, %c0_19, %c25, %c0_20] : memref<1x1x256x8xf32, #tpu.memory_space<vmem>>, vector<1x1x192x8xf32>
    %17 = vector.shape_cast %16 : vector<1x1x192x8xf32> to vector<192x8xf32>
    %18 = arith.truncf %17 : vector<192x8xf32> to vector<192x8xbf16>
    %c0_21 = arith.constant 0 : index
    %c32 = arith.constant 32 : index
    %19 = vector.load %arg6[%c0_21, %c32] : memref<192x72xbf16, #tpu.memory_space<vmem>>, vector<192x8xbf16>
    tpu.vector_store %arg6[%c0_21, %c32], %18 {strides = array<i32>} : memref<192x72xbf16, #tpu.memory_space<vmem>>, vector<192x8xbf16>,
    %c0_22 = arith.constant 0 : index
    %c0_23 = arith.constant 0 : index
    %c26 = arith.constant 26 : index
    %c0_24 = arith.constant 0 : index
    %20 = vector.load %arg2[%c0_22, %c0_23, %c26, %c0_24] : memref<1x1x256x8xf32, #tpu.memory_space<vmem>>, vector<1x1x192x8xf32>
    %21 = vector.shape_cast %20 : vector<1x1x192x8xf32> to vector<192x8xf32>
    %22 = arith.truncf %21 : vector<192x8xf32> to vector<192x8xbf16>
    %c0_25 = arith.constant 0 : index
    %c40 = arith.constant 40 : index
    %23 = vector.load %arg6[%c0_25, %c40] : memref<192x72xbf16, #tpu.memory_space<vmem>>, vector<192x8xbf16>
    tpu.vector_store %arg6[%c0_25, %c40], %22 {strides = array<i32>} : memref<192x72xbf16, #tpu.memory_space<vmem>>, vector<192x8xbf16>,
    %c0_26 = arith.constant 0 : index
    %c0_27 = arith.constant 0 : index
    %c48 = arith.constant 48 : index
    %c0_28 = arith.constant 0 : index
    %24 = vector.load %arg2[%c0_26, %c0_27, %c48, %c0_28] : memref<1x1x256x8xf32, #tpu.memory_space<vmem>>, vector<1x1x192x8xf32>
    %25 = vector.shape_cast %24 : vector<1x1x192x8xf32> to vector<192x8xf32>
    %26 = arith.truncf %25 : vector<192x8xf32> to vector<192x8xbf16>
    %c0_29 = arith.constant 0 : index
    %c48_30 = arith.constant 48 : index
    %27 = vector.load %arg6[%c0_29, %c48_30] : memref<192x72xbf16, #tpu.memory_space<vmem>>, vector<192x8xbf16>
    tpu.vector_store %arg6[%c0_29, %c48_30], %26 {strides = array<i32>} : memref<192x72xbf16, #tpu.memory_space<vmem>>, vector<192x8xbf16>,
    %c0_31 = arith.constant 0 : index
    %c0_32 = arith.constant 0 : index
    %c49 = arith.constant 49 : index
    %c0_33 = arith.constant 0 : index
    %28 = vector.load %arg2[%c0_31, %c0_32, %c49, %c0_33] : memref<1x1x256x8xf32, #tpu.memory_space<vmem>>, vector<1x1x192x8xf32>
    %29 = vector.shape_cast %28 : vector<1x1x192x8xf32> to vector<192x8xf32>
    %30 = arith.truncf %29 : vector<192x8xf32> to vector<192x8xbf16>
    %c0_34 = arith.constant 0 : index
    %c56 = arith.constant 56 : index
    %31 = vector.load %arg6[%c0_34, %c56] : memref<192x72xbf16, #tpu.memory_space<vmem>>, vector<192x8xbf16>
    tpu.vector_store %arg6[%c0_34, %c56], %30 {strides = array<i32>} : memref<192x72xbf16, #tpu.memory_space<vmem>>, vector<192x8xbf16>,
    %c0_35 = arith.constant 0 : index
    %c0_36 = arith.constant 0 : index
    %c50 = arith.constant 50 : index
    %c0_37 = arith.constant 0 : index
    %32 = vector.load %arg2[%c0_35, %c0_36, %c50, %c0_37] : memref<1x1x256x8xf32, #tpu.memory_space<vmem>>, vector<1x1x192x8xf32>
    %33 = vector.shape_cast %32 : vector<1x1x192x8xf32> to vector<192x8xf32>
    %34 = arith.truncf %33 : vector<192x8xf32> to vector<192x8xbf16>
    %c0_38 = arith.constant 0 : index
    %c64 = arith.constant 64 : index
    %35 = vector.load %arg6[%c0_38, %c64] : memref<192x72xbf16, #tpu.memory_space<vmem>>, vector<192x8xbf16>
    tpu.vector_store %arg6[%c0_38, %c64], %34 {strides = array<i32>} : memref<192x72xbf16, #tpu.memory_space<vmem>>, vector<192x8xbf16>,
    %c0_39 = arith.constant 0 : index
    %c0_40 = arith.constant 0 : index
    %36 = vector.load %arg6[%c0_39, %c0_40] : memref<192x72xbf16, #tpu.memory_space<vmem>>, vector<192x72xbf16>
    %c0_41 = arith.constant 0 : index
    %c0_42 = arith.constant 0 : index
    %37 = vector.load %arg3[%c0_41, %c0_42] : memref<72x128xbf16, #tpu.memory_space<vmem>>, vector<72x128xbf16>
    %cst = arith.constant dense<0.000000e+00> : vector<192x128xf32>
    %38 = tpu.matmul %36, %37, %cst {dimension_numbers = #tpu.dot_dimension_numbers<[1], [0], [0], [1], [0, 0, 1, 1], [], []>} : vector<192x72xbf16>, vector<72x128xbf16>, vector<192x128xf32> -> vector<192x128xf32>
    %c0_43 = arith.constant 0 : index
    %c0_44 = arith.constant 0 : index
    %39 = vector.load %arg4[%c0_43, %c0_44] : memref<1x128xf32, #tpu.memory_space<vmem>>, vector<1x128xf32>
    %40 = vector.broadcast %39 : vector<1x128xf32> to vector<192x128xf32>
    %41 = arith.addf %38, %40 : vector<192x128xf32>
    %42 = vector.extract_strided_slice %41 {offsets = [0, 0], sizes = [16, 128], strides = [1, 1]} : vector<192x128xf32> to vector<16x128xf32>
    %c0_45 = arith.constant 0 : index
    %c0_46 = arith.constant 0 : index
    %c0_47 = arith.constant 0 : index
    %c0_48 = arith.constant 0 : index
    %43 = vector.load %arg5[%c0_45, %c0_46, %c0_47, %c0_48] : memref<1x8x16x128xf32, #tpu.memory_space<vmem>>, vector<1x1x16x128xf32>
    %44 = vector.shape_cast %43 : vector<1x1x16x128xf32> to vector<16x128xf32>
    %45 = vector.shape_cast %42 : vector<16x128xf32> to vector<1x1x16x128xf32>
    tpu.vector_store %arg5[%c0_45, %c0_46, %c0_47, %c0_48], %45 {strides = array<i32>} : memref<1x8x16x128xf32, #tpu.memory_space<vmem>>, vector<1x1x16x128xf32>,
    %46 = vector.extract_strided_slice %41 {offsets = [24, 0], sizes = [16, 128], strides = [1, 1]} : vector<192x128xf32> to vector<16x128xf32>
    %c0_49 = arith.constant 0 : index
    %c1_50 = arith.constant 1 : index
    %c0_51 = arith.constant 0 : index
    %c0_52 = arith.constant 0 : index
    %47 = vector.load %arg5[%c0_49, %c1_50, %c0_51, %c0_52] : memref<1x8x16x128xf32, #tpu.memory_space<vmem>>, vector<1x1x16x128xf32>
    %48 = vector.shape_cast %47 : vector<1x1x16x128xf32> to vector<16x128xf32>
    %49 = vector.shape_cast %46 : vector<16x128xf32> to vector<1x1x16x128xf32>
    tpu.vector_store %arg5[%c0_49, %c1_50, %c0_51, %c0_52], %49 {strides = array<i32>} : memref<1x8x16x128xf32, #tpu.memory_space<vmem>>, vector<1x1x16x128xf32>,
    %50 = vector.extract_strided_slice %41 {offsets = [48, 0], sizes = [16, 128], strides = [1, 1]} : vector<192x128xf32> to vector<16x128xf32>
    %c0_53 = arith.constant 0 : index
    %c2_54 = arith.constant 2 : index
    %c0_55 = arith.constant 0 : index
    %c0_56 = arith.constant 0 : index
    %51 = vector.load %arg5[%c0_53, %c2_54, %c0_55, %c0_56] : memref<1x8x16x128xf32, #tpu.memory_space<vmem>>, vector<1x1x16x128xf32>
    %52 = vector.shape_cast %51 : vector<1x1x16x128xf32> to vector<16x128xf32>
    %53 = vector.shape_cast %50 : vector<16x128xf32> to vector<1x1x16x128xf32>
    tpu.vector_store %arg5[%c0_53, %c2_54, %c0_55, %c0_56], %53 {strides = array<i32>} : memref<1x8x16x128xf32, #tpu.memory_space<vmem>>, vector<1x1x16x128xf32>,
    %54 = vector.extract_strided_slice %41 {offsets = [72, 0], sizes = [16, 128], strides = [1, 1]} : vector<192x128xf32> to vector<16x128xf32>
    %c0_57 = arith.constant 0 : index
    %c3 = arith.constant 3 : index
    %c0_58 = arith.constant 0 : index
    %c0_59 = arith.constant 0 : index
    %55 = vector.load %arg5[%c0_57, %c3, %c0_58, %c0_59] : memref<1x8x16x128xf32, #tpu.memory_space<vmem>>, vector<1x1x16x128xf32>
    %56 = vector.shape_cast %55 : vector<1x1x16x128xf32> to vector<16x128xf32>
    %57 = vector.shape_cast %54 : vector<16x128xf32> to vector<1x1x16x128xf32>
    tpu.vector_store %arg5[%c0_57, %c3, %c0_58, %c0_59], %57 {strides = array<i32>} : memref<1x8x16x128xf32, #tpu.memory_space<vmem>>, vector<1x1x16x128xf32>,
    %58 = vector.extract_strided_slice %41 {offsets = [96, 0], sizes = [16, 128], strides = [1, 1]} : vector<192x128xf32> to vector<16x128xf32>
    %c0_60 = arith.constant 0 : index
    %c4 = arith.constant 4 : index
    %c0_61 = arith.constant 0 : index
    %c0_62 = arith.constant 0 : index
    %59 = vector.load %arg5[%c0_60, %c4, %c0_61, %c0_62] : memref<1x8x16x128xf32, #tpu.memory_space<vmem>>, vector<1x1x16x128xf32>
    %60 = vector.shape_cast %59 : vector<1x1x16x128xf32> to vector<16x128xf32>
    %61 = vector.shape_cast %58 : vector<16x128xf32> to vector<1x1x16x128xf32>
    tpu.vector_store %arg5[%c0_60, %c4, %c0_61, %c0_62], %61 {strides = array<i32>} : memref<1x8x16x128xf32, #tpu.memory_space<vmem>>, vector<1x1x16x128xf32>,
    %62 = vector.extract_strided_slice %41 {offsets = [120, 0], sizes = [16, 128], strides = [1, 1]} : vector<192x128xf32> to vector<16x128xf32>
    %c0_63 = arith.constant 0 : index
    %c5 = arith.constant 5 : index
    %c0_64 = arith.constant 0 : index
    %c0_65 = arith.constant 0 : index
    %63 = vector.load %arg5[%c0_63, %c5, %c0_64, %c0_65] : memref<1x8x16x128xf32, #tpu.memory_space<vmem>>, vector<1x1x16x128xf32>
    %64 = vector.shape_cast %63 : vector<1x1x16x128xf32> to vector<16x128xf32>
    %65 = vector.shape_cast %62 : vector<16x128xf32> to vector<1x1x16x128xf32>
    tpu.vector_store %arg5[%c0_63, %c5, %c0_64, %c0_65], %65 {strides = array<i32>} : memref<1x8x16x128xf32, #tpu.memory_space<vmem>>, vector<1x1x16x128xf32>,
    %66 = vector.extract_strided_slice %41 {offsets = [144, 0], sizes = [16, 128], strides = [1, 1]} : vector<192x128xf32> to vector<16x128xf32>
    %c0_66 = arith.constant 0 : index
    %c6 = arith.constant 6 : index
    %c0_67 = arith.constant 0 : index
    %c0_68 = arith.constant 0 : index
    %67 = vector.load %arg5[%c0_66, %c6, %c0_67, %c0_68] : memref<1x8x16x128xf32, #tpu.memory_space<vmem>>, vector<1x1x16x128xf32>
    %68 = vector.shape_cast %67 : vector<1x1x16x128xf32> to vector<16x128xf32>
    %69 = vector.shape_cast %66 : vector<16x128xf32> to vector<1x1x16x128xf32>
    tpu.vector_store %arg5[%c0_66, %c6, %c0_67, %c0_68], %69 {strides = array<i32>} : memref<1x8x16x128xf32, #tpu.memory_space<vmem>>, vector<1x1x16x128xf32>,
    %70 = vector.extract_strided_slice %41 {offsets = [168, 0], sizes = [16, 128], strides = [1, 1]} : vector<192x128xf32> to vector<16x128xf32>
    %c0_69 = arith.constant 0 : index
    %c7 = arith.constant 7 : index
    %c0_70 = arith.constant 0 : index
    %c0_71 = arith.constant 0 : index
    %71 = vector.load %arg5[%c0_69, %c7, %c0_70, %c0_71] : memref<1x8x16x128xf32, #tpu.memory_space<vmem>>, vector<1x1x16x128xf32>
    %72 = vector.shape_cast %71 : vector<1x1x16x128xf32> to vector<16x128xf32>
    %73 = vector.shape_cast %70 : vector<16x128xf32> to vector<1x1x16x128xf32>
    tpu.vector_store %arg5[%c0_69, %c7, %c0_70, %c0_71], %73 {strides = array<i32>} : memref<1x8x16x128xf32, #tpu.memory_space<vmem>>, vector<1x1x16x128xf32>,
    return
  }
  func.func @transform_0(%arg0: i32, %arg1: i32) -> (i32, i32, i32, i32) {
    %c0_i32 = arith.constant 0 : i32
    %c0_i32_0 = arith.constant 0 : i32
    %c0_i32_1 = arith.constant 0 : i32
    return %arg0, %arg1, %c0_i32, %c0_i32_0 : i32, i32, i32, i32
  }
  func.func @transform_1(%arg0: i32, %arg1: i32) -> (i32, i32) {
    %c0_i32 = arith.constant 0 : i32
    %c0_i32_0 = arith.constant 0 : i32
    %c0_i32_1 = arith.constant 0 : i32
    return %c0_i32, %c0_i32_0 : i32, i32
  }
  func.func @transform_2(%arg0: i32, %arg1: i32) -> (i32, i32) {
    %c0_i32 = arith.constant 0 : i32
    %c0_i32_0 = arith.constant 0 : i32
    %c0_i32_1 = arith.constant 0 : i32
    return %c0_i32, %c0_i32_0 : i32, i32
  }
  func.func @transform_3(%arg0: i32, %arg1: i32) -> (i32, i32, i32, i32) {
    %c0_i32 = arith.constant 0 : i32
    %c0_i32_0 = arith.constant 0 : i32
    %c0_i32_1 = arith.constant 0 : i32
    return %arg0, %arg1, %c0_i32, %c0_i32_0 : i32, i32, i32, i32
  }
}

</mosaic_0001>

<bundles_post_ra>
// kernel: tpu_custom_call.1
= control target key start
LH: loop header
LB: loop body
LE: loop exit
PB: predicated region body
PF: predicated region fallthrough
CT: control target
= control target key end

     0   :  { %8 = vsyncpa [#allocation4], 0  ;;  %s2504_s0 = inlined_call_operand.vmem [shape: f32[2,2,256,8], index: 0, kind: input, shape index: {}]   ;;  %s2505_s1 = inlined_call_operand.vmem [shape: bf16[72,128], index: 1, kind: input, shape index: {}]   ;;  %s2506_s2 = inlined_call_operand.vmem [shape: f32[1,128], index: 2, kind: input, shape index: {}]   ;;  %s2507_s3 = inlined_call_operand.hbm [shape: f32[2,16,16,128], index: 3, kind: output, shape index: {}]  }
   0x1   :  { %10 = vsyncpa [#allocation4 + $0x1], 0  ;;  %s1689_s12 = smov 0   ;;  %s1691_s13 = smov 0  }
   0x2   :  { %s1693_s14 = smov 0   ;;  %s1695_s15 = smov 0  }
   0x3   :  { %s1697_s16 = smov 0   ;;  %s1699_s17 = smov 0  }
   0x4   :  { %s1701_s18 = smov 0   ;;  %s1703_s19 = smov 0  }
   0x5 LB: > { %s1366_s20 = sadd.s32 4294967295, %s1657_s19   ;;  %s1367_s21 = sadd.s32 4294967294, %s1657_s19   ;;  %s1657_s19 = sphi %s1703_s19, %s16_s19   ;;  %s1653_s18 = sphi %s1701_s18, %s2525_s18   ;;  %s1649_s17 = sphi %s1699_s17, %s2524_s17   ;;  %s1645_s16 = sphi %s1697_s16, %s2523_s16   ;;  %s1641_s15 = sphi %s1695_s15, %s2522_s15   ;;  %s1637_s14 = sphi %s1693_s14, %s2521_s14   ;;  %s1633_s13 = sphi %s1691_s13, %s2520_s13   ;;  %s1629_s12 = sphi %s1689_s12, %s2519_s12  }
   0x6   : > { %s25_s22 = sadd.s32 1, %s1649_s17  ;;  %s28_s23 = sadd.s32 1, %s1653_s18 }
   0x7   : > { %p26_p0 = scmp.ge.s32.totalorder %s25_s22, 2  ;;  %p117_p1 = scmp.ne.s32.totalorder %s1637_s14, %s1633_s13 }
   0x8   : > { %p118_p2 = scmp.eq.s32.totalorder %s1366_s20, 3  ;;  %p123_p5 = scmp.ne.s32.totalorder %s1633_s13, %s1629_s12 }
   0x9   : > { %s2527_s22 = smov (%p26_p0, %s25_s22), 0  ;;  %s2529_s23 = smov (!%p26_p0, %s28_s23), %s1653_s18 }
   0xa   : > { %s103_s24 = ssub.s32 %s1649_s17, %s2527_s22  ;;  %p1740_p3 = por %p118_p2, %p117_p1 }
   0xb   : > { %p30_p4 = scmp.ge.s32.totalorder %s2529_s23, 2  ;;  %p124_p6 = scmp.eq.s32.totalorder %s1367_s21, 3 }
   0xc   : > { %p1370_p7 = scmp.ge.s32.totalorder %s1657_s19, 1  ;;  %p160_p9 = scmp.lt.s32.totalorder %s1657_s19, 5 }
   0xd   : > { %s2531_s23 = smov (%p30_p4, %s2529_s23), 0  ;;  %p1749_p8 = por %p124_p6, %p123_p5 }
   0xe   : > { %s102_s27 = ssub.s32 %s1653_s18, %s2531_s23  ;;  %s107_s28 = sadd.s32 1, %s1637_s14 }
   0xf   : > { %s104_s29 = sor.u32 %s103_s24, %s102_s27  ;;  %p161_p10 = pnand %p1370_p7, %p160_p9 }
  0x10   : > { %p105_p11 = scmp.eq.s32.totalorder %s104_s29, 0  ;;  %p188_p12 = scmp.lt.s32.totalorder (!%p161_p10), %s1645_s16, 1  ;;  %vm235_vm0 = vcmask (!%p161_p10), 64512   ;;  %vm1116_vm1 = vcmask (!%p161_p10), 1043456   ;;  %vm332_vm2 = vcmask (!%p161_p10), 130112   ;;  %vm429_vm3 = vcmask (!%p161_p10), 195712  }
  0x11   : > { %164 = sbr.rel (%p161_p10) target bundleno = 578 (0x242), region = 32  ;;  %p190_p13 = scmp.lt.s32.totalorder (!%p161_p10), %s1641_s15, 1  ;;  %vm526_vm4 = vcmask (!%p161_p10), 261312   ;;  %vm623_vm5 = vcmask (!%p161_p10), 326912   ;;  %vm720_vm6 = vcmask (!%p161_p10), 392512   ;;  %vm817_vm7 = vcmask (!%p161_p10), 458112  }
  0x12   : > { %s1758_s30 = scalar_select %p105_p11, %s1637_s14, %s107_s28  }
  0x13   : > { %s1659_s21 = smov (!%p161_p10), 8   ;;  %s1660_s24 = smov (!%p161_p10), 16   ;;  %vm914_vm8 = vcmask (!%p161_p10), 523712   ;;  %vm1011_vm9 = vcmask (!%p161_p10), 589312   ;;  %vm1079_vm10 = vcmask (!%p161_p10), 588800  }
  0x14   : > { %s1661_s27 = smov (!%p161_p10), 24   ;;  %s1662_s28 = smov (!%p161_p10), 32  }
  0x15   : > { %s1663_s29 = smov (!%p161_p10), 40   ;;  %s1665_s11 = smov (!%p161_p10), 56  }
  0x16   : > { %s1410_s10 = sshll.u32 (!%p161_p10), %s1645_s16, 5 }
  0x18   : > { %s189_s4 = scalar_select %p188_p12, %s1645_s16, 1 }
  0x19   : > { %s191_s5 = scalar_select %p190_p13, %s1641_s15, 1 }
  0x1a   : > { %s1373_s6 = sshll.u32 %s189_s4, 6 }
  0x1b   : > { %s1372_s7 = sshll.u32 %s191_s5, 5 }
  0x1c   : > { %s194_s8 = sadd.s32 %s1373_s6, %s1372_s7  ;;  %s1664_s6 = smov 48  }
  0x1d   : > { %s1374_s9 = sshll.u32 %s194_s8, 3 }
  0x1e   : > { %s1767_s20 = scalar_lea.vmem %s2504_s0, %s1374_s9  ;;  %s1666_s9 = smov 64  }
  0x1f   : > { %v250_v0 = vld [vmem:[%s1767_s20 + $0x11] sm:$0xff]  ;;  %v1771_v1 = vld [vmem:[%s1767_s20 + $0x19] sm:$0xff]  ;;  %v248_v2 = vld [vmem:[%s1767_s20 + $0x1] sm:$0xff] }
  0x20   : > { %v273_v3 = vpack.c.bf16 %v1771_v1, %v250_v0  ;;  %v249_v4 = vld [vmem:[%s1767_s20 + $0x9] sm:$0xff]  ;;  %v1777_v5 = vld [vmem:[%s1767_s20 + $0x71] sm:$0xff]  ;;  %v1780_v6 = vld [vmem:[%s1767_s20 + $0x79] sm:$0xff] }
  0x21   : > { %v272_v7 = vpack.c.bf16 %v249_v4, %v248_v2  ;;  %v1783_v8 = vld [vmem:[%s1767_s20 + $0x61] sm:$0xff]  ;;  %v1786_v9 = vld [vmem:[%s1767_s20 + $0x69] sm:$0xff]  ;;  %v1791_v10 = vpack.c.bf16 %v1780_v6, %v1777_v5  ;;  %v1815_v18 = vld [vmem:[%s1767_s20 + $0x72] sm:$0xff] }
  0x22   : > { %298 = vrot.lane.b32.xlu1 %v273_v3, %s1659_s21  ;;  %v1796_v11 = vpack.c.bf16 %v1786_v9, %v1783_v8  ;;  %v1799_v12 = vld [vmem:[%s1767_s20 + $0x62] sm:$0xff]  ;;  %v1802_v13 = vld [vmem:[%s1767_s20 + $0x6a] sm:$0xff]  ;;  %v1818_v19 = vld [vmem:[%s1767_s20 + $0x7a] sm:$0xff] }
  0x23   : > { %296 = vrot.lane.b32.xlu0 %v272_v7, %s1659_s21  ;;  %v345_v14 = vld [vmem:[%s1767_s20 + $0x2] sm:$0xff]  ;;  %v346_v15 = vld [vmem:[%s1767_s20 + $0xa] sm:$0xff]  ;;  %v1810_v16 = vpack.c.bf16 %v1802_v13, %v1799_v12  ;;  %v347_v20 = vld [vmem:[%s1767_s20 + $0x12] sm:$0xff]  ;;  %v1834_v24 = vpack.c.bf16 %v1818_v19, %v1815_v18 }
  0x24   : > { %v369_v17 = vpack.c.bf16 %v346_v15, %v345_v14  ;;  %v1822_v21 = vld [vmem:[%s1767_s20 + $0x1a] sm:$0xff]  ;;  %v457_v27 = vld [vmem:[%s1767_s20 + $0x90] sm:$0xff]  ;;  %v1862_v35 = vld [vmem:[%s1767_s20 + $0xa8] sm:$0xff] }
  0x25   : > { %v1825_v22 = vld [vmem:[%s1767_s20 + $0x78] sm:$0xff]  ;;  %v1828_v23 = vld [vmem:[%s1767_s20 + $0x80] sm:$0xff]  ;;  %v445_v28 = vld [vmem:[%s1767_s20 + $0x30] sm:$0xff]  ;;  %v370_v29 = vpack.c.bf16 %v1822_v21, %v347_v20 }
  0x26   : > { %310 = vrot.lane.b32.xlu1 %v1791_v10, %s1659_s21  ;;  %v1837_v25 = vld [vmem:[%s1767_s20 + $0x18] sm:$0xff]  ;;  %v1840_v26 = vld [vmem:[%s1767_s20 + $0x20] sm:$0xff]  ;;  %v1868_v37 = vld [vmem:[%s1767_s20 + $0x48] sm:$0xff]  ;;  %v472_v42 = vpack.c.bf16 %v1828_v23, %v1825_v22 }
  0x27   : > { %308 = vrot.lane.b32.xlu0 %v1796_v11, %s1659_s21  ;;  %v1847_v30 = vld [vmem:[%s1767_s20 + $0x98] sm:$0xff]  ;;  %v1853_v32 = vld [vmem:[%s1767_s20 + $0xa0] sm:$0xff]  ;;  %v466_v43 = vpack.c.bf16 %v1840_v26, %v1837_v25  ;;  %v1894_v44 = vld [vmem:[%s1767_s20 + $0x88] sm:$0xff] }
  0x28   : > { %v1850_v31 = vld [vmem:[%s1767_s20 + $0x38] sm:$0xff]  ;;  %v1856_v33 = vpack.c.bf16 %v1847_v30, %v457_v27  ;;  %v1865_v36 = vld [vmem:[%s1767_s20 + $0x40] sm:$0xff]  ;;  %v474_v38 = vpack.c.bf16 %v1853_v32, %v1847_v30  ;;  %v1874_v39 = vpack.c.bf16 %v1862_v35, %v1853_v32  ;;  %v1901_v45 = vld [vmem:[%s1767_s20 + $0x28] sm:$0xff]  ;;  %v473_v48 = vpack.c.bf16 %v457_v27, %v1894_v44 }
  0x29   : > { %v1859_v34 = vpack.c.bf16 %v1850_v31, %v445_v28  ;;  %v1878_v40 = vpack.c.bf16 %v1868_v37, %v1865_v36  ;;  %v468_v41 = vpack.c.bf16 %v1865_v36, %v1850_v31  ;;  %v1904_v46 = vld [vmem:[%s1767_s20 + $0xb0] sm:$0xff]  ;;  %v1912_v49 = vld [vmem:[%s1767_s20 + $0x81] sm:$0xff]  ;;  %v467_v52 = vpack.c.bf16 %v445_v28, %v1901_v45  ;;  %v1921_v53 = vld [vmem:[%s1767_s20 + $0xb8] sm:$0xff] }
  0x2a   : > { %405 = vrot.lane.b32.xlu1 %v1810_v16, %s1660_s24  ;;  %245 = vst.msk [vmem:[#allocation2 + $0x48] sm:$0xff] %vm235_vm0, %v1856_v33  ;;  %246 = vst.msk [vmem:[#allocation2 + $0x50] sm:$0xff] %vm235_vm0, %v1874_v39  ;;  %v1907_v47 = vld [vmem:[%s1767_s20 + $0x50] sm:$0xff]  ;;  %v1924_v54 = vld [vmem:[%s1767_s20 + $0x58] sm:$0xff]  ;;  %v1934_v57 = vpack.c.bf16 %v1921_v53, %v1904_v46  ;;  %v569_v2 = vpack.c.bf16 %v1912_v49, %v1780_v6 }
  0x2b   : > { %393 = vrot.lane.b32.xlu0 %v369_v17, %s1660_s24  ;;  %239 = vst.msk [vmem:[#allocation2 + $0x18] sm:$0xff] %vm235_vm0, %v1859_v34  ;;  %240 = vst.msk [vmem:[#allocation2 + $0x20] sm:$0xff] %vm235_vm0, %v1878_v40  ;;  %v1927_v55 = vld [vmem:[%s1767_s20 + $0xc0] sm:$0xff]  ;;  %v1938_v58 = vpack.c.bf16 %v1924_v54, %v1907_v47  ;;  %v1944_v60 = vld [vmem:[%s1767_s20 + $0x68] sm:$0xff]  ;;  %v2511_v30 = vpack.c.bf16 %v1907_v47, %v1868_v37 }
  0x2c   : > { %v1930_v56 = vld [vmem:[%s1767_s20 + $0x21] sm:$0xff]  ;;  %v201_v63 = vld [vmem:[%s1767_s20 + $0x10] sm:$0xff]  ;;  %247 = vst.msk [vmem:[#allocation2 + $0x58] sm:$0xff] %vm235_vm0, %v1934_v57  ;;  %v1982_v28 = vld [vmem:[%s1767_s20 + $0x59] sm:$0xff] }
  0x2d   : > { %v1941_v59 = vld [vmem:[%s1767_s20 + $0x60] sm:$0xff]  ;;  %v224_v3 = vpack.c.bf16 %v1837_v25, %v201_v63  ;;  %v200_v7 = vld [vmem:[%s1767_s20 + $0x8] sm:$0xff]  ;;  %241 = vst.msk [vmem:[#allocation2 + $0x28] sm:$0xff] %vm235_vm0, %v1938_v58  ;;  %v563_v14 = vpack.c.bf16 %v1930_v56, %v1771_v1  ;;  %v554_v17 = vld [vmem:[%s1767_s20 + $0x91] sm:$0xff] }
  0x2e   : > { %407 = vrot.lane.b32.xlu1 %v1834_v24, %s1660_s24  ;;  %v1950_v62 = vpack.c.bf16 %v1944_v60, %v1941_v59  ;;  %v199_v4 = vld [vmem:[%s1767_s20] sm:$0xff]  ;;  %v1969_v15 = vld [vmem:[%s1767_s20 + $0x89] sm:$0xff]  ;;  %v542_v27 = vld [vmem:[%s1767_s20 + $0x31] sm:$0xff] }
  0x2f   : > { %395 = vrot.lane.b32.xlu0 %v370_v29, %s1660_s24  ;;  %v223_v20 = vpack.c.bf16 %v200_v7, %v199_v4  ;;  %v1973_v6 = vld [vmem:[%s1767_s20 + $0x70] sm:$0xff]  ;;  %237 = vst.msk [vmem:[#allocation2 + $0x8] sm:$0xff] %vm235_vm0, %v224_v3  ;;  %v929_v61 = vld [vmem:[%s1767_s20 + $0x42] sm:$0xff] }
  0x30   : > { %242 = vst.msk [vmem:[#allocation2 + $0x30] sm:$0xff] %vm235_vm0, %v1950_v62  ;;  %v1978_v25 = vld [vmem:[%s1767_s20 + $0x29] sm:$0xff]  ;;  %v1987_v1 = vpack.c.bf16 %v1825_v22, %v1973_v6  ;;  %v651_v7 = vld [vmem:[%s1767_s20 + $0x92] sm:$0xff] }
  0x31   : > { %236 = vst.msk [vmem:[#allocation2] sm:$0xff] %vm235_vm0, %v223_v20  ;;  %v564_v22 = vpack.c.bf16 %v542_v27, %v1978_v25  ;;  %v2015_v4 = vld [vmem:[%s1767_s20 + $0x8a] sm:$0xff]  ;;  %v639_v20 = vld [vmem:[%s1767_s20 + $0x32] sm:$0xff] }
  0x32   : > { %502 = vrot.lane.b32.xlu1 %v472_v42, %s1661_s27  ;;  %243 = vst.msk [vmem:[#allocation2 + $0x38] sm:$0xff] %vm235_vm0, %v1987_v1  ;;  %v2023_v42 = vld [vmem:[%s1767_s20 + $0x5a] sm:$0xff]  ;;  %v942_v0 = vld [vmem:[%s1767_s20 + $0xaa] sm:$0xff]  ;;  %v643_v47 = vld [vmem:[%s1767_s20 + $0x52] sm:$0xff] }
  0x33   : > { %490 = vrot.lane.b32.xlu0 %v466_v43, %s1661_s27  ;;  %v570_v43 = vpack.c.bf16 %v554_v17, %v1969_v15  ;;  %v930_v51 = vld [vmem:[%s1767_s20 + $0x4a] sm:$0xff] }
  0x34   : > { %v558_v31 = vld [vmem:[%s1767_s20 + $0xb1] sm:$0xff] }
  0x35   : > { %v546_v36 = vld [vmem:[%s1767_s20 + $0x51] sm:$0xff] }
  0x36   : > { %504 = vrot.lane.b32.xlu1 %v473_v48, %s1661_s27  ;;  %v2001_v48 = vld [vmem:[%s1767_s20 + $0x82] sm:$0xff] }
  0x37   : > { %492 = vrot.lane.b32.xlu0 %v467_v52, %s1661_s27  ;;  %v2004_v52 = vld [vmem:[%s1767_s20 + $0x22] sm:$0xff] }
  0x38   : > { %v660_v3 = vpack.c.bf16 %v2004_v52, %v1822_v21 }
  0x3a   : > { %599 = vrot.lane.b32.xlu1 %v569_v2, %s1662_s28  ;;  %v666_v2 = vpack.c.bf16 %v2001_v48, %v1818_v19  ;;  %v667_v19 = vpack.c.bf16 %v651_v7, %v2015_v4 }
  0x3b   : > { %587 = vrot.lane.b32.xlu0 %v563_v14, %s1662_s28  ;;  %v2019_v14 = vld [vmem:[%s1767_s20 + $0x2a] sm:$0xff] }
  0x3c   : > { %v661_v21 = vpack.c.bf16 %v639_v20, %v2019_v14 }
  0x3e   : > { %601 = vrot.lane.b32.xlu1 %v570_v43, %s1662_s28  ;;  %v1558_v43 = vld [vmem:[%s2505_s1] sm:$0xff]  }
  0x3f   : > { %589 = vrot.lane.b32.xlu0 %v564_v22, %s1662_s28  ;;  %1432 = vmatprep.subr.bf16.mxu0 %v1558_v43  ;;  %v2065_v22 = vld [vmem:[%s1767_s20 + $0xa9] sm:$0xff] }
  0x40   : > { %1466 = vmatprep.subr.bf16.mxu1 %v1558_v43  ;;  %1433 = vmatpush3.bf16.msra.mxu0 %v1558_v43 }
  0x41   : > { %1471 = vmatpush3.bf16.msra.mxu1 %v1558_v43  ;;  %v2062_v43 = vld [vmem:[%s1767_s20 + $0xa1] sm:$0xff] }
  0x42   : > { %696 = vrot.lane.b32.xlu1 %v666_v2, %s1663_s29  ;;  %v2043_v2 = vld [vmem:[%s1767_s20 + $0x99] sm:$0xff] }
  0x43   : > { %684 = vrot.lane.b32.xlu0 %v660_v3, %s1663_s29  ;;  %v2046_v3 = vld [vmem:[%s1767_s20 + $0x39] sm:$0xff] }
  0x46   : > { %698 = vrot.lane.b32.xlu1 %v667_v19, %s1663_s29  ;;  %v1559_v19 = vld [vmem:[%s2505_s1 + $0x8] sm:$0xff]  }
  0x47   : > { %686 = vrot.lane.b32.xlu0 %v661_v21, %s1663_s29  ;;  %1434 = vmatprep.subr.bf16.mxu0 %v1559_v19  ;;  %v854_v21 = vpack.c.bf16 %v2046_v3, %v542_v27  ;;  %v928_v27 = vld [vmem:[%s1767_s20 + $0x3a] sm:$0xff] }
  0x48   : > { %1467 = vmatprep.subr.bf16.mxu1 %v1559_v19  ;;  %1435 = vmatpush3.bf16.msra.mxu0 %v1559_v19  ;;  %v951_v63 = vpack.c.bf16 %v928_v27, %v639_v20  ;;  %v274_v20 = vpack.c.bf16 %v1978_v25, %v1930_v56  ;;  %v2129_v56 = vpack.c.bf16 %v2015_v4, %v2001_v48 }
  0x49   : > { %1472 = vmatpush3.bf16.msra.mxu1 %v1559_v19  ;;  %v1561_v19 = vld [vmem:[%s2505_s1 + $0x18] sm:$0xff]   ;;  %v2510_v25 = vpack.c.bf16 %v1904_v46, %v1862_v35  ;;  %v572_v35 = vpack.c.bf16 %v558_v31, %v2065_v22  ;;  %v662_v37 = vpack.c.bf16 %v929_v61, %v928_v27  ;;  %v856_v4 = vpack.c.bf16 %v1982_v28, %v546_v36 }
  0x4a   : > { %793 = vrot.lane.b32.xlu1 %v1856_v33, %s1664_s6  ;;  %v2053_v33 = vpack.c.bf16 %v1894_v44, %v1828_v23  ;;  %v225_v23 = vpack.c.bf16 %v1901_v45, %v1840_v26  ;;  %v2075_v44 = vld [vmem:[%s1767_s20 + $0x49] sm:$0xff]  ;;  %v940_v45 = vld [vmem:[%s1767_s20 + $0x9a] sm:$0xff]  ;;  %v655_v46 = vld [vmem:[%s1767_s20 + $0xb2] sm:$0xff] }
  0x4b   : > { %781 = vrot.lane.b32.xlu0 %v1859_v34, %s1664_s6  ;;  %v860_v34 = vpack.c.bf16 %v2043_v2, %v554_v17  ;;  %v2084_v17 = vpack.c.bf16 %v2065_v22, %v2062_v43  ;;  %v669_v48 = vpack.c.bf16 %v655_v46, %v942_v0  ;;  %v2201_v22 = vld [vmem:[%s1767_s20 + $0xba] sm:$0xff] }
  0x4c   : > { %244 = vst.msk [vmem:[#allocation2 + $0x40] sm:$0xff] %vm235_vm0, %v2053_v33  ;;  %238 = vst.msk [vmem:[#allocation2 + $0x10] sm:$0xff] %vm235_vm0, %v225_v23  ;;  %v957_v23 = vpack.c.bf16 %v940_v45, %v651_v7  ;;  %v2106_v7 = vpack.c.bf16 %v1969_v15, %v1912_v49  ;;  %v2120_v49 = vpack.c.bf16 %v930_v51, %v929_v61 }
  0x4d   : > { %v371_v15 = vpack.c.bf16 %v2019_v14, %v2004_v52  ;;  %v663_v52 = vpack.c.bf16 %v643_v47, %v930_v51  ;;  %v2191_v14 = vld [vmem:[%s1767_s20 + $0xc1] sm:$0xff] }
  0x4e   : > { %795 = vrot.lane.b32.xlu1 %v1874_v39, %s1664_s6  ;;  %v2072_v39 = vld [vmem:[%s1767_s20 + $0x41] sm:$0xff] }
  0x4f   : > { %783 = vrot.lane.b32.xlu0 %v1878_v40, %s1664_s6  ;;  %v1560_v40 = vld [vmem:[%s2505_s1 + $0x10] sm:$0xff]   ;;  %v2089_v26 = vpack.c.bf16 %v2075_v44, %v2072_v39  ;;  %v565_v32 = vpack.c.bf16 %v2072_v39, %v2046_v3  ;;  %v959_v3 = vpack.c.bf16 %v2201_v22, %v655_v46  ;;  %v2215_v39 = vld [vmem:[%s1767_s20 + $0xc2] sm:$0xff]  ;;  %v2516_v46 = vpack.c.bf16 %v1777_v5, %v1786_v9  ;;  %v754_v9 = vld [vmem:[%s1767_s20 + $0xd8] sm:$0xff] }
  0x50   : > { %1436 = vmatprep.subr.bf16.mxu0 %v1560_v40  ;;  %1468 = vmatprep.subr.bf16.mxu1 %v1560_v40  ;;  %v2517_v5 = vpack.c.bf16 %v1799_v12, %v2023_v42 }
  0x51   : > { %1437 = vmatpush3.bf16.msra.mxu0 %v1560_v40  ;;  %1473 = vmatpush3.bf16.msra.mxu1 %v1560_v40  ;;  %v1562_v40 = vld [vmem:[%s2505_s1 + $0x20] ss:$0 sps:$4 sm:$0xff]  }
  0x52   : > { %890 = vrot.lane.b32.xlu1 %v860_v34, %s1665_s11  ;;  %1438 = vmatprep.subr.bf16.mxu0 %v1561_v19  ;;  %v1118_v29 = vsel %vm1116_vm1, %v1562_v40, 0 }
  0x53   : > { %878 = vrot.lane.b32.xlu0 %v854_v21, %s1665_s11  ;;  %1469 = vmatprep.subr.bf16.mxu1 %v1561_v19 }
  0x55   : > { %1439 = vmatpush3.bf16.msra.mxu0 %v1561_v19  ;;  %1474 = vmatpush3.bf16.msra.mxu1 %v1561_v19  ;;  %v941_v19 = vld [vmem:[%s1767_s20 + $0xa2] sm:$0xff] }
  0x56   : > { %892 = vrot.lane.b32.xlu1 %v2084_v17, %s1665_s11  ;;  %1476 = vmatprep.subr.msk.bf16.mxu0 %vm1116_vm1, %v1562_v40  ;;  %v2117_v50 = vpack.c.bf16 %v942_v0, %v941_v19  ;;  %v2183_v0 = vld [vmem:[%s1767_s20 + $0xb9] sm:$0xff] }
  0x57   : > { %880 = vrot.lane.b32.xlu0 %v2089_v26, %s1665_s11  ;;  %1477 = vmatprep.subr.msk.bf16.mxu1 %vm1116_vm1, %v1562_v40  ;;  %v862_v51 = vpack.c.bf16 %v2183_v0, %v558_v31 }
  0x59   : > { %1441 = vmatpush3.bf16.msra.mxu0 %v1118_v29  ;;  %1475 = vmatpush3.bf16.msra.mxu1 %v1118_v29  ;;  %v571_v29 = vpack.c.bf16 %v2062_v43, %v2043_v2 }
  0x5a   : > { %987 = vrot.lane.b32.xlu1 %v957_v23, %s1666_s9 }
  0x5b   : > { %975 = vrot.lane.b32.xlu0 %v951_v63, %s1666_s9 }
  0x5e   : > { %312 = vrot.lane.b32.xlu1 %v2106_v7, %s1659_s21 }
  0x5f   : > { %300 = vrot.lane.b32.xlu0 %v274_v20, %s1659_s21 }
  0x62   : > { %989 = vrot.lane.b32.xlu1 %v2117_v50, %s1666_s9 }
  0x63   : > { %977 = vrot.lane.b32.xlu0 %v2120_v49, %s1666_s9 }
  0x66   : > { %314 = vrot.lane.b32.xlu1 %v860_v34, %s1659_s21  ;;  %v953_v34 = vpack.c.bf16 %v2023_v42, %v643_v47  ;;  %v2287_v47 = vld [vmem:[%s1767_s20 + $0xd2] sm:$0xff] }
  0x67   : > { %302 = vrot.lane.b32.xlu0 %v854_v21, %s1659_s21 }
  0x6a   : > { %409 = vrot.lane.b32.xlu1 %v2129_v56, %s1660_s24 }
  0x6b   : > { %397 = vrot.lane.b32.xlu0 %v371_v15, %s1660_s24 }
  0x6e   : > { %411 = vrot.lane.b32.xlu1 %v957_v23, %s1660_s24 }
  0x6f   : > { %399 = vrot.lane.b32.xlu0 %v951_v63, %s1660_s24  ;;  %v2174_v63 = vld [vmem:[%s1767_s20 + $0xc8] sm:$0xff] }
  0x70   : > { %v766_v61 = vpack.c.bf16 %v2174_v63, %v1927_v55 }
  0x72   : > { %506 = vrot.lane.b32.xlu1 %v474_v38, %s1661_s27  ;;  %v566_v38 = vpack.c.bf16 %v546_v36, %v2075_v44  ;;  %v2218_v44 = vld [vmem:[%s1767_s20 + $0xca] sm:$0xff] }
  0x73   : > { %494 = vrot.lane.b32.xlu0 %v468_v41, %s1661_s27  ;;  %v668_v41 = vpack.c.bf16 %v941_v19, %v940_v45  ;;  %v960_v27 = vpack.c.bf16 %v2218_v44, %v2215_v39 }
  0x76   : > { %508 = vrot.lane.b32.xlu1 %v2510_v25, %s1661_s27  ;;  %v465_v25 = vld [vmem:[%s1767_s20 + $0xd0] sm:$0xff] }
  0x77   : > { %496 = vrot.lane.b32.xlu0 %v2511_v30, %s1661_s27  ;;  %v477_v30 = vpack.c.bf16 %v465_v25, %v2174_v63 }
  0x7a   : > { %603 = vrot.lane.b32.xlu1 %v571_v29, %s1662_s28 }
  0x7b   : > { %591 = vrot.lane.b32.xlu0 %v565_v32, %s1662_s28  ;;  %v2513_v32 = vpack.c.bf16 %v1941_v59, %v1924_v54 }
  0x7e   : > { %605 = vrot.lane.b32.xlu1 %v572_v35, %s1662_s28  ;;  %v562_v35 = vld [vmem:[%s1767_s20 + $0xd1] sm:$0xff] }
  0x7f   : > { %593 = vrot.lane.b32.xlu0 %v566_v38, %s1662_s28 }
  0x82   : > { %700 = vrot.lane.b32.xlu1 %v668_v41, %s1663_s29  ;;  %v2515_v41 = vpack.c.bf16 %v1783_v8, %v1982_v28 }
  0x83   : > { %688 = vrot.lane.b32.xlu0 %v662_v37, %s1663_s29  ;;  %v670_v37 = vpack.c.bf16 %v2215_v39, %v2201_v22  ;;  %v852_v22 = vld [vmem:[%s1767_s20 + $0xe1] sm:$0xff] }
  0x86   : > { %702 = vrot.lane.b32.xlu1 %v669_v48, %s1663_s29  ;;  %v671_v48 = vpack.c.bf16 %v2287_v47, %v2218_v44 }
  0x87   : > { %690 = vrot.lane.b32.xlu0 %v663_v52, %s1663_s29 }
  0x8a   : > { %797 = vrot.lane.b32.xlu1 %v1934_v57, %s1664_s6  ;;  %v2194_v57 = vld [vmem:[%s1767_s20 + $0xc9] sm:$0xff] }
  0x8b   : > { %785 = vrot.lane.b32.xlu0 %v1938_v58, %s1664_s6  ;;  %v863_v58 = vpack.c.bf16 %v2194_v57, %v2191_v14  ;;  %v574_v38 = vpack.c.bf16 %v562_v35, %v2194_v57  ;;  %v851_v57 = vld [vmem:[%s1767_s20 + $0xd9] sm:$0xff] }
  0x8e   : > { %799 = vrot.lane.b32.xlu1 %v766_v61, %s1664_s6  ;;  %v767_v61 = vpack.c.bf16 %v754_v9, %v465_v25 }
  0x8f   : > { %787 = vrot.lane.b32.xlu0 %v1950_v62, %s1664_s6 }
  0x92   : > { %894 = vrot.lane.b32.xlu1 %v862_v51, %s1665_s11 }
  0x93   : > { %882 = vrot.lane.b32.xlu0 %v856_v4, %s1665_s11 }
  0x94   : > { %v299_v2 = vpop.permute.xlu1 %298 }
  0x95   : > { %334 = vst.msk [vmem:[#allocation2 + $0x8] sm:$0xff] %vm332_vm2, %v299_v2  ;;  %v297_v62 = vpop.permute.xlu0 %296  ;;  %v853_v2 = vld [vmem:[%s1767_s20 + $0xe9] sm:$0xff] }
  0x96   : > { %333 = vst.msk [vmem:[#allocation2] sm:$0xff] %vm332_vm2, %v297_v62  ;;  %896 = vrot.lane.b32.xlu1 %v863_v58, %s1665_s11  ;;  %v864_v58 = vpack.c.bf16 %v851_v57, %v562_v35 }
  0x97   : > { %884 = vrot.lane.b32.xlu0 %v1796_v11, %s1665_s11 }
  0x98   : > { %v311_v21 = vpop.permute.xlu1 %310 }
  0x99   : > { %340 = vst.msk [vmem:[#allocation2 + $0x38] sm:$0xff] %vm332_vm2, %v311_v21  ;;  %v309_v43 = vpop.permute.xlu0 %308 }
  0x9a   : > { %339 = vst.msk [vmem:[#allocation2 + $0x30] sm:$0xff] %vm332_vm2, %v309_v43  ;;  %991 = vrot.lane.b32.xlu1 %v959_v3, %s1666_s9 }
  0x9b   : > { %979 = vrot.lane.b32.xlu0 %v953_v34, %s1666_s9 }
  0x9c   : > { %v406_v45 = vpop.permute.xlu1 %405 }
  0x9d   : > { %436 = vst.msk [vmem:[#allocation2 + $0x30] sm:$0xff] %vm429_vm3, %v406_v45  ;;  %v394_v11 = vpop.permute.xlu0 %393  ;;  %v950_v45 = vld [vmem:[%s1767_s20 + $0xea] sm:$0xff] }
  0x9e   : > { %430 = vst.msk [vmem:[#allocation2] sm:$0xff] %vm429_vm3, %v394_v11  ;;  %316 = vrot.lane.b32.xlu1 %v2084_v17, %s1659_s21 }
  0x9f   : > { %304 = vrot.lane.b32.xlu0 %v2089_v26, %s1659_s21 }
  0xa0   : > { %v408_v23 = vpop.permute.xlu1 %407 }
  0xa1   : > { %437 = vst.msk [vmem:[#allocation2 + $0x38] sm:$0xff] %vm429_vm3, %v408_v23  ;;  %v396_v40 = vpop.permute.xlu0 %395 }
  0xa2   : > { %431 = vst.msk [vmem:[#allocation2 + $0x8] sm:$0xff] %vm429_vm3, %v396_v40  ;;  %993 = vrot.lane.b32.xlu1 %v960_v27, %s1666_s9 }
  0xa3   : > { %981 = vrot.lane.b32.xlu0 %v1810_v16, %s1666_s9 }
  0xa4   : > { %v503_v20 = vpop.permute.xlu1 %502 }
  0xa5   : > { %533 = vst.msk [vmem:[#allocation2 + $0x30] sm:$0xff] %vm526_vm4, %v503_v20  ;;  %v491_v17 = vpop.permute.xlu0 %490 }
  0xa6   : > { %527 = vst.msk [vmem:[#allocation2] sm:$0xff] %vm526_vm4, %v491_v17  ;;  %318 = vrot.lane.b32.xlu1 %v862_v51, %s1659_s21  ;;  %v755_v51 = vld [vmem:[%s1767_s20 + $0xe0] sm:$0xff] }
  0xa7   : > { %306 = vrot.lane.b32.xlu0 %v856_v4, %s1659_s21  ;;  %v756_v4 = vld [vmem:[%s1767_s20 + $0xe8] sm:$0xff] }
  0xa8   : > { %v505_v26 = vpop.permute.xlu1 %504 }
  0xa9   : > { %534 = vst.msk [vmem:[#allocation2 + $0x38] sm:$0xff] %vm526_vm4, %v505_v26  ;;  %v493_v19 = vpop.permute.xlu0 %492 }
  0xaa   : > { %528 = vst.msk [vmem:[#allocation2 + $0x8] sm:$0xff] %vm526_vm4, %v493_v19  ;;  %413 = vrot.lane.b32.xlu1 %v2117_v50, %s1660_s24 }
  0xab   : > { %401 = vrot.lane.b32.xlu0 %v2120_v49, %s1660_s24  ;;  %v2512_v49 = vpack.c.bf16 %v1927_v55, %v1921_v53  ;;  %v573_v53 = vpack.c.bf16 %v2191_v14, %v2183_v0  ;;  %v2514_v55 = vpack.c.bf16 %v1973_v6, %v1944_v60  ;;  %v2518_v0 = vpack.c.bf16 %v1815_v18, %v1802_v13 }
  0xac   : > { %v600_v16 = vpop.permute.xlu1 %599  ;;  %v768_v14 = vpack.c.bf16 %v756_v4, %v755_v51 }
  0xad   : > { %630 = vst.msk [vmem:[#allocation2 + $0x30] sm:$0xff] %vm623_vm5, %v600_v16  ;;  %v588_v15 = vpop.permute.xlu0 %587 }
  0xae   : > { %624 = vst.msk [vmem:[#allocation2] sm:$0xff] %vm623_vm5, %v588_v15  ;;  %415 = vrot.lane.b32.xlu1 %v959_v3, %s1660_s24  ;;  %v865_v3 = vpack.c.bf16 %v853_v2, %v852_v22 }
  0xaf   : > { %403 = vrot.lane.b32.xlu0 %v953_v34, %s1660_s24  ;;  %v948_v34 = vld [vmem:[%s1767_s20 + $0xda] sm:$0xff] }
  0xb0   : > { %v602_v29 = vpop.permute.xlu1 %601  ;;  %v961_v44 = vpack.c.bf16 %v948_v34, %v2287_v47 }
  0xb1   : > { %631 = vst.msk [vmem:[#allocation2 + $0x38] sm:$0xff] %vm623_vm5, %v602_v29  ;;  %v590_v50 = vpop.permute.xlu0 %589 }
  0xb2   : > { %625 = vst.msk [vmem:[#allocation2 + $0x8] sm:$0xff] %vm623_vm5, %v590_v50  ;;  %510 = vrot.lane.b32.xlu1 %v2512_v49, %s1661_s27 }
  0xb3   : > { %498 = vrot.lane.b32.xlu0 %v2513_v32, %s1661_s27 }
  0xb4   : > { %v697_v31 = vpop.permute.xlu1 %696 }
  0xb5   : > { %727 = vst.msk [vmem:[#allocation2 + $0x30] sm:$0xff] %vm720_vm6, %v697_v31  ;;  %v685_v36 = vpop.permute.xlu0 %684 }
  0xb6   : > { %721 = vst.msk [vmem:[#allocation2] sm:$0xff] %vm720_vm6, %v685_v36  ;;  %512 = vrot.lane.b32.xlu1 %v477_v30, %s1661_s27 }
  0xb7   : > { %500 = vrot.lane.b32.xlu0 %v2514_v55, %s1661_s27 }
  0xb8   : > { %v699_v54 = vpop.permute.xlu1 %698 }
  0xb9   : > { %728 = vst.msk [vmem:[#allocation2 + $0x38] sm:$0xff] %vm720_vm6, %v699_v54  ;;  %v687_v59 = vpop.permute.xlu0 %686 }
  0xba   : > { %722 = vst.msk [vmem:[#allocation2 + $0x8] sm:$0xff] %vm720_vm6, %v687_v59  ;;  %607 = vrot.lane.b32.xlu1 %v573_v53, %s1662_s28 }
  0xbb   : > { %595 = vrot.lane.b32.xlu0 %v2515_v41, %s1662_s28 }
  0xbc   : > { %v794_v60 = vpop.permute.xlu1 %793 }
  0xbd   : > { %824 = vst.msk [vmem:[#allocation2 + $0x30] sm:$0xff] %vm817_vm7, %v794_v60  ;;  %v782_v6 = vpop.permute.xlu0 %781 }
  0xbe   : > { %818 = vst.msk [vmem:[#allocation2] sm:$0xff] %vm817_vm7, %v782_v6  ;;  %609 = vrot.lane.b32.xlu1 %v574_v38, %s1662_s28 }
  0xbf   : > { %597 = vrot.lane.b32.xlu0 %v2516_v46, %s1662_s28 }
  0xc0   : > { %v796_v8 = vpop.permute.xlu1 %795 }
  0xc1   : > { %825 = vst.msk [vmem:[#allocation2 + $0x38] sm:$0xff] %vm817_vm7, %v796_v8  ;;  %v784_v28 = vpop.permute.xlu0 %783 }
  0xc2   : > { %819 = vst.msk [vmem:[#allocation2 + $0x8] sm:$0xff] %vm817_vm7, %v784_v28  ;;  %704 = vrot.lane.b32.xlu1 %v670_v37, %s1663_s29 }
  0xc3   : > { %692 = vrot.lane.b32.xlu0 %v2517_v5, %s1663_s29 }
  0xc4   : > { %v891_v52 = vpop.permute.xlu1 %890 }
  0xc5   : > { %921 = vst.msk [vmem:[#allocation2 + $0x30] sm:$0xff] %vm914_vm8, %v891_v52  ;;  %v879_v63 = vpop.permute.xlu0 %878 }
  0xc6   : > { %915 = vst.msk [vmem:[#allocation2] sm:$0xff] %vm914_vm8, %v879_v63  ;;  %706 = vrot.lane.b32.xlu1 %v671_v48, %s1663_s29 }
  0xc7   : > { %694 = vrot.lane.b32.xlu0 %v2518_v0, %s1663_s29 }
  0xc8   : > { %v893_v12 = vpop.permute.xlu1 %892 }
  0xc9   : > { %922 = vst.msk [vmem:[#allocation2 + $0x38] sm:$0xff] %vm914_vm8, %v893_v12  ;;  %v881_v42 = vpop.permute.xlu0 %880 }
  0xca   : > { %916 = vst.msk [vmem:[#allocation2 + $0x8] sm:$0xff] %vm914_vm8, %v881_v42  ;;  %801 = vrot.lane.b32.xlu1 %v767_v61, %s1664_s6 }
  0xcb   : > { %789 = vrot.lane.b32.xlu0 %v1987_v1, %s1664_s6 }
  0xcc   : > { %v988_v13 = vpop.permute.xlu1 %987 }
  0xcd   : > { %1018 = vst.msk [vmem:[#allocation2 + $0x30] sm:$0xff] %vm1011_vm9, %v988_v13  ;;  %v976_v18 = vpop.permute.xlu0 %975 }
  0xce   : > { %1012 = vst.msk [vmem:[#allocation2] sm:$0xff] %vm1011_vm9, %v976_v18  ;;  %803 = vrot.lane.b32.xlu1 %v768_v14, %s1664_s6 }
  0xcf   : > { %791 = vrot.lane.b32.xlu0 %v2053_v33, %s1664_s6  ;;  %s1414_s6 = sshll.u32 %s1641_s15, 4 }
  0xd0   : > { %v313_v62 = vpop.permute.xlu1 %312 }
  0xd1   : > { %341 = vst.msk [vmem:[#allocation2 + $0x40] sm:$0xff] %vm332_vm2, %v313_v62  ;;  %v301_v1 = vpop.permute.xlu0 %300 }
  0xd2   : > { %335 = vst.msk [vmem:[#allocation2 + $0x10] sm:$0xff] %vm332_vm2, %v301_v1  ;;  %898 = vrot.lane.b32.xlu1 %v864_v58, %s1665_s11 }
  0xd3   : > { %886 = vrot.lane.b32.xlu0 %v1791_v10, %s1665_s11  ;;  %v949_v10 = vld [vmem:[%s1767_s20 + $0xe2] sm:$0xff]  ;;  %s185_s20 = sand.u32 1, %s1633_s13  }
  0xd4   : > { %v990_v21 = vpop.permute.xlu1 %989  ;;  %v1030_v33 = vld [vmem:[#allocation2 + $0x30] sm:$0xff]  ;;  %v962_v23 = vpack.c.bf16 %v950_v45, %v949_v10  ;;  %s1371_s24 = sshll.u32 %s185_s20, 7  ;;  %s2451_s8 = scalar_lea.sflag [#allocation4], %s185_s20 }
  0xd5   : > { %1019 = vst.msk [vmem:[#allocation2 + $0x38] sm:$0xff] %vm1011_vm9, %v990_v21  ;;  %v978_v43 = vpop.permute.xlu0 %977  ;;  %v1024_v39 = vld [vmem:[#allocation2] sm:$0xff]  ;;  %1454 = vmatprep.mubr.msk.bf16.mxu1 %vm1079_vm10, %v1030_v33  ;;  %s2421_s29 = scalar_lea.vmem [#allocation3], %s1371_s24  ;;  %s1667_s24 = smov [#allocation3]  }
  0xd6   : > { %1013 = vst.msk [vmem:[#allocation2 + $0x8] sm:$0xff] %vm1011_vm9, %v978_v43  ;;  %1442 = vmatprep.mubr.msk.bf16.mxu0 %vm1079_vm10, %v1024_v39  ;;  %900 = vrot.lane.b32.xlu1 %v865_v3, %s1665_s11  ;;  %s1281_s5 = sshll.u32 %s2421_s29, 4  ;;  %s1567_s27 = sshll.u32 %s1667_s24, 4  ;;  %s2445_s5 = int_to_ptr.vmem [resolvable:$true] %s1281_s5  ;;  %s1568_s27 = int_to_ptr.vmem [resolvable:$false] %s1567_s27 }
  0xd7   : > { %888 = vrot.lane.b32.xlu0 %v2106_v7, %s1665_s11  ;;  %s1278_s11 = sadd.s32 %s1414_s6, %s1410_s10  ;;  %s1569_s28 = scalar_lea.vmem %s1568_s27, 4096 }
  0xd8   : > { %v315_v11 = vpop.permute.xlu1 %314  ;;  %s1411_s4 = sshll.u32 %s1278_s11, 7  ;;  %p1570_p4 = scmp.lt.s32.totalorder %s2445_s5, %s1568_s27 }
  0xd9   : > { %342 = vst.msk [vmem:[#allocation2 + $0x48] sm:$0xff] %vm332_vm2, %v315_v11  ;;  %v303_v27 = vpop.permute.xlu0 %302  ;;  %s2443_s7 = scalar_lea.hbm %s2507_s3, %s1411_s4 }
  0xda   : > { %336 = vst.msk [vmem:[#allocation2 + $0x18] sm:$0xff] %vm332_vm2, %v303_v27  ;;  %995 = vrot.lane.b32.xlu1 %v961_v44, %s1666_s9 }
  0xdb   : > { %983 = vrot.lane.b32.xlu0 %v1834_v24, %s1666_s9 }
  0xdc   : > { %v410_v40 = vpop.permute.xlu1 %409  ;;  %v1031_v20 = vld [vmem:[#allocation2 + $0x38] sm:$0xff] }
  0xdd   : > { %438 = vst.msk [vmem:[#allocation2 + $0x40] sm:$0xff] %vm429_vm3, %v410_v40  ;;  %v398_v17 = vpop.permute.xlu0 %397  ;;  %v1025_v7 = vld [vmem:[#allocation2 + $0x8] sm:$0xff]  ;;  %1455 = vmatmul.mubr.msk.bf16.vlgmr.msra.gmra.mrb[0].mxu1 %vm1079_vm10, %v1031_v20 }
  0xde   : > { %432 = vst.msk [vmem:[#allocation2 + $0x10] sm:$0xff] %vm429_vm3, %v398_v17  ;;  %1443 = vmatmul.mubr.msk.bf16.vlgmr.msra.gmra.mrb[0].mxu0 %vm1079_vm10, %v1025_v7  ;;  %997 = vrot.lane.b32.xlu1 %v962_v23, %s1666_s9 }
  0xdf   : > { %985 = vrot.lane.b32.xlu0 %v2129_v56, %s1666_s9  ;;  %s1563_s9 = scalar_lea.vmem %s2445_s5, 2048 }
  0xe0   : > { %v412_v26 = vpop.permute.xlu1 %411  ;;  %p1564_p0 = scmp.ne.s32.totalorder %s2445_s5, %s1563_s9  ;;  %p1571_p5 = scmp.lt.s32.totalorder %s1569_s28, %s1563_s9 }
  0xe1   : > { %439 = vst.msk [vmem:[#allocation2 + $0x48] sm:$0xff] %vm429_vm3, %v412_v26  ;;  %v400_v24 = vpop.permute.xlu0 %399 }
  0xe2   : > { %433 = vst.msk [vmem:[#allocation2 + $0x18] sm:$0xff] %vm429_vm3, %v400_v24  ;;  %p1565_p1 = pnand %p1564_p0, %p1740_p3  ;;  %p1572_p6 = por %p1571_p5, %p1570_p4 }
  0xe4   : > { %v507_v19 = vpop.permute.xlu1 %506  ;;  %p1566_p2 = pneg %p1565_p1 }
  0xe5   : > { %535 = vst.msk [vmem:[#allocation2 + $0x40] sm:$0xff] %vm526_vm4, %v507_v19  ;;  %v495_v16 = vpop.permute.xlu0 %494  ;;  %v1375_v19 = vld [vmem:[%s2506_s2] ss:$0 sm:$0xff] }
  0xe6   : > { %529 = vst.msk [vmem:[#allocation2 + $0x10] sm:$0xff] %vm526_vm4, %v495_v16  ;;  %p1573_p7 = pnand %p1572_p6, %p1566_p2 }
  0xe8   : > { %v509_v15 = vpop.permute.xlu1 %508 }
  0xe9   : > { %536 = vst.msk [vmem:[#allocation2 + $0x48] sm:$0xff] %vm526_vm4, %v509_v15  ;;  %v497_v25 = vpop.permute.xlu0 %496 }
  0xea   : > { %530 = vst.msk [vmem:[#allocation2 + $0x18] sm:$0xff] %vm526_vm4, %v497_v25 }
  0xec   : > { %v604_v29 = vpop.permute.xlu1 %603 }
  0xed   : > { %632 = vst.msk [vmem:[#allocation2 + $0x40] sm:$0xff] %vm623_vm5, %v604_v29  ;;  %v592_v56 = vpop.permute.xlu0 %591 }
  0xee   : > { %626 = vst.msk [vmem:[#allocation2 + $0x10] sm:$0xff] %vm623_vm5, %v592_v56 }
  0xf0   : > { %v606_v50 = vpop.permute.xlu1 %605 }
  0xf1   : > { %633 = vst.msk [vmem:[#allocation2 + $0x48] sm:$0xff] %vm623_vm5, %v606_v50  ;;  %v594_v49 = vpop.permute.xlu0 %593 }
  0xf2   : > { %627 = vst.msk [vmem:[#allocation2 + $0x18] sm:$0xff] %vm623_vm5, %v594_v49 }
  0xf4   : > { %v701_v30 = vpop.permute.xlu1 %700 }
  0xf5   : > { %729 = vst.msk [vmem:[#allocation2 + $0x40] sm:$0xff] %vm720_vm6, %v701_v30  ;;  %v689_v32 = vpop.permute.xlu0 %688 }
  0xf6   : > { %723 = vst.msk [vmem:[#allocation2 + $0x10] sm:$0xff] %vm720_vm6, %v689_v32 }
  0xf8   : > { %v703_v31 = vpop.permute.xlu1 %702 }
  0xf9   : > { %730 = vst.msk [vmem:[#allocation2 + $0x48] sm:$0xff] %vm720_vm6, %v703_v31  ;;  %v691_v36 = vpop.permute.xlu0 %690 }
  0xfa   : > { %724 = vst.msk [vmem:[#allocation2 + $0x18] sm:$0xff] %vm720_vm6, %v691_v36 }
  0xfc   : > { %v798_v53 = vpop.permute.xlu1 %797 }
  0xfd   : > { %826 = vst.msk [vmem:[#allocation2 + $0x40] sm:$0xff] %vm817_vm7, %v798_v53  ;;  %v786_v55 = vpop.permute.xlu0 %785 }
  0xfe   : > { %820 = vst.msk [vmem:[#allocation2 + $0x10] sm:$0xff] %vm817_vm7, %v786_v55 }
 0x100   : > { %v800_v35 = vpop.permute.xlu1 %799 }
 0x101   : > { %827 = vst.msk [vmem:[#allocation2 + $0x48] sm:$0xff] %vm817_vm7, %v800_v35  ;;  %v788_v54 = vpop.permute.xlu0 %787 }
 0x102   : > { %821 = vst.msk [vmem:[#allocation2 + $0x18] sm:$0xff] %vm817_vm7, %v788_v54 }
 0x104   : > { %v895_v59 = vpop.permute.xlu1 %894 }
 0x105   : > { %923 = vst.msk [vmem:[#allocation2 + $0x40] sm:$0xff] %vm914_vm8, %v895_v59  ;;  %v883_v38 = vpop.permute.xlu0 %882 }
 0x106   : > { %917 = vst.msk [vmem:[#allocation2 + $0x10] sm:$0xff] %vm914_vm8, %v883_v38 }
 0x108   : > { %v897_v41 = vpop.permute.xlu1 %896 }
 0x109   : > { %924 = vst.msk [vmem:[#allocation2 + $0x48] sm:$0xff] %vm914_vm8, %v897_v41  ;;  %v885_v60 = vpop.permute.xlu0 %884 }
 0x10a   : > { %918 = vst.msk [vmem:[#allocation2 + $0x18] sm:$0xff] %vm914_vm8, %v885_v60 }
 0x10c   : > { %v992_v6 = vpop.permute.xlu1 %991 }
 0x10d   : > { %1020 = vst.msk [vmem:[#allocation2 + $0x40] sm:$0xff] %vm1011_vm9, %v992_v6  ;;  %v980_v37 = vpop.permute.xlu0 %979 }
 0x10e   : > { %1014 = vst.msk [vmem:[#allocation2 + $0x10] sm:$0xff] %vm1011_vm9, %v980_v37 }
 0x110   : > { %v317_v46 = vpop.permute.xlu1 %316 }
 0x111   : > { %343 = vst.msk [vmem:[#allocation2 + $0x50] sm:$0xff] %vm332_vm2, %v317_v46  ;;  %v305_v47 = vpop.permute.xlu0 %304 }
 0x112   : > { %337 = vst.msk [vmem:[#allocation2 + $0x20] sm:$0xff] %vm332_vm2, %v305_v47 }
 0x114   : > { %v994_v8 = vpop.permute.xlu1 %993  ;;  %v1032_v28 = vld [vmem:[#allocation2 + $0x40] sm:$0xff] }
 0x115   : > { %1021 = vst.msk [vmem:[#allocation2 + $0x48] sm:$0xff] %vm1011_vm9, %v994_v8  ;;  %v982_v48 = vpop.permute.xlu0 %981  ;;  %v1026_v5 = vld [vmem:[#allocation2 + $0x10] sm:$0xff]  ;;  %1458 = vmatprep.mubr.msk.bf16.mxu1 %vm1079_vm10, %v1032_v28 }
 0x116   : > { %1015 = vst.msk [vmem:[#allocation2 + $0x18] sm:$0xff] %vm1011_vm9, %v982_v48  ;;  %1446 = vmatprep.mubr.msk.bf16.mxu0 %vm1079_vm10, %v1026_v5 }
 0x118   : > { %v319_v9 = vpop.permute.xlu1 %318 }
 0x119   : > { %344 = vst.msk [vmem:[#allocation2 + $0x58] sm:$0xff] %vm332_vm2, %v319_v9  ;;  %v307_v52 = vpop.permute.xlu0 %306 }
 0x11a   : > { %338 = vst.msk [vmem:[#allocation2 + $0x28] sm:$0xff] %vm332_vm2, %v307_v52 }
 0x11c   : > { %v414_v63 = vpop.permute.xlu1 %413  ;;  %v1033_v61 = vld [vmem:[#allocation2 + $0x48] sm:$0xff] }
 0x11d   : > { %440 = vst.msk [vmem:[#allocation2 + $0x50] sm:$0xff] %vm429_vm3, %v414_v63  ;;  %v402_v0 = vpop.permute.xlu0 %401  ;;  %v1027_v51 = vld [vmem:[#allocation2 + $0x18] sm:$0xff]  ;;  %1459 = vmatmul.mubr.msk.bf16.gmra.mrb[4].mxu1 %vm1079_vm10, %v1033_v61 }
 0x11e   : > { %434 = vst.msk [vmem:[#allocation2 + $0x20] sm:$0xff] %vm429_vm3, %v402_v0  ;;  %1447 = vmatmul.mubr.msk.bf16.gmra.mrb[4].mxu0 %vm1079_vm10, %v1027_v51 }
 0x120   : > { %v416_v4 = vpop.permute.xlu1 %415 }
 0x121   : > { %441 = vst.msk [vmem:[#allocation2 + $0x58] sm:$0xff] %vm429_vm3, %v416_v4  ;;  %v404_v12 = vpop.permute.xlu0 %403 }
 0x122   : > { %435 = vst.msk [vmem:[#allocation2 + $0x28] sm:$0xff] %vm429_vm3, %v404_v12 }
 0x124   : > { %v511_v42 = vpop.permute.xlu1 %510 }
 0x125   : > { %537 = vst.msk [vmem:[#allocation2 + $0x50] sm:$0xff] %vm526_vm4, %v511_v42  ;;  %v499_v14 = vpop.permute.xlu0 %498 }
 0x126   : > { %531 = vst.msk [vmem:[#allocation2 + $0x20] sm:$0xff] %vm526_vm4, %v499_v14 }
 0x128   : > { %v513_v57 = vpop.permute.xlu1 %512 }
 0x129   : > { %538 = vst.msk [vmem:[#allocation2 + $0x58] sm:$0xff] %vm526_vm4, %v513_v57  ;;  %v501_v13 = vpop.permute.xlu0 %500 }
 0x12a   : > { %532 = vst.msk [vmem:[#allocation2 + $0x28] sm:$0xff] %vm526_vm4, %v501_v13 }
 0x12c   : > { %v608_v18 = vpop.permute.xlu1 %607 }
 0x12d   : > { %634 = vst.msk [vmem:[#allocation2 + $0x50] sm:$0xff] %vm623_vm5, %v608_v18  ;;  %v596_v58 = vpop.permute.xlu0 %595 }
 0x12e   : > { %628 = vst.msk [vmem:[#allocation2 + $0x20] sm:$0xff] %vm623_vm5, %v596_v58 }
 0x130   : > { %v610_v22 = vpop.permute.xlu1 %609 }
 0x131   : > { %635 = vst.msk [vmem:[#allocation2 + $0x58] sm:$0xff] %vm623_vm5, %v610_v22  ;;  %v598_v2 = vpop.permute.xlu0 %597 }
 0x132   : > { %629 = vst.msk [vmem:[#allocation2 + $0x28] sm:$0xff] %vm623_vm5, %v598_v2 }
 0x134   : > { %v705_v62 = vpop.permute.xlu1 %704 }
 0x135   : > { %731 = vst.msk [vmem:[#allocation2 + $0x50] sm:$0xff] %vm720_vm6, %v705_v62  ;;  %v693_v1 = vpop.permute.xlu0 %692 }
 0x136   : > { %725 = vst.msk [vmem:[#allocation2 + $0x20] sm:$0xff] %vm720_vm6, %v693_v1 }
 0x138   : > { %v707_v3 = vpop.permute.xlu1 %706 }
 0x139   : > { %732 = vst.msk [vmem:[#allocation2 + $0x58] sm:$0xff] %vm720_vm6, %v707_v3  ;;  %v695_v34 = vpop.permute.xlu0 %694 }
 0x13a   : > { %726 = vst.msk [vmem:[#allocation2 + $0x28] sm:$0xff] %vm720_vm6, %v695_v34 }
 0x13c   : > { %v802_v21 = vpop.permute.xlu1 %801 }
 0x13d   : > { %828 = vst.msk [vmem:[#allocation2 + $0x50] sm:$0xff] %vm817_vm7, %v802_v21  ;;  %v790_v33 = vpop.permute.xlu0 %789 }
 0x13e   : > { %822 = vst.msk [vmem:[#allocation2 + $0x20] sm:$0xff] %vm817_vm7, %v790_v33 }
 0x140   : > { %v804_v43 = vpop.permute.xlu1 %803 }
 0x141   : > { %829 = vst.msk [vmem:[#allocation2 + $0x58] sm:$0xff] %vm817_vm7, %v804_v43  ;;  %v792_v39 = vpop.permute.xlu0 %791 }
 0x142   : > { %823 = vst.msk [vmem:[#allocation2 + $0x28] sm:$0xff] %vm817_vm7, %v792_v39 }
 0x144   : > { %v899_v44 = vpop.permute.xlu1 %898 }
 0x145   : > { %925 = vst.msk [vmem:[#allocation2 + $0x50] sm:$0xff] %vm914_vm8, %v899_v44  ;;  %v887_v10 = vpop.permute.xlu0 %886 }
 0x146   : > { %919 = vst.msk [vmem:[#allocation2 + $0x20] sm:$0xff] %vm914_vm8, %v887_v10 }
 0x148   : > { %v901_v45 = vpop.permute.xlu1 %900 }
 0x149   : > { %926 = vst.msk [vmem:[#allocation2 + $0x58] sm:$0xff] %vm914_vm8, %v901_v45  ;;  %v889_v11 = vpop.permute.xlu0 %888 }
 0x14a   : > { %920 = vst.msk [vmem:[#allocation2 + $0x28] sm:$0xff] %vm914_vm8, %v889_v11 }
 0x14c   : > { %v996_v27 = vpop.permute.xlu1 %995 }
 0x14d   : > { %1022 = vst.msk [vmem:[#allocation2 + $0x50] sm:$0xff] %vm1011_vm9, %v996_v27  ;;  %v984_v23 = vpop.permute.xlu0 %983 }
 0x14e   : > { %1016 = vst.msk [vmem:[#allocation2 + $0x20] sm:$0xff] %vm1011_vm9, %v984_v23 }
 0x150   : > { %v998_v40 = vpop.permute.xlu1 %997 }
 0x151   : > { %1023 = vst.msk [vmem:[#allocation2 + $0x58] sm:$0xff] %vm1011_vm9, %v998_v40  ;;  %v986_v20 = vpop.permute.xlu0 %985 }
 0x152   : > { %1017 = vst.msk [vmem:[#allocation2 + $0x28] sm:$0xff] %vm1011_vm9, %v986_v20 }
 0x154   : > { %v1034_v17 = vld [vmem:[#allocation2 + $0x50] sm:$0xff] }
 0x155   : > { %v1028_v7 = vld [vmem:[#allocation2 + $0x20] sm:$0xff]  ;;  %1462 = vmatprep.mubr.msk.bf16.mxu1 %vm1079_vm10, %v1034_v17 }
 0x156   : > { %1450 = vmatprep.mubr.msk.bf16.mxu0 %vm1079_vm10, %v1028_v7 }
 0x158   : > { %v1035_v26 = vld [vmem:[#allocation2 + $0x58] sm:$0xff] }
 0x159   : > { %v1029_v24 = vld [vmem:[#allocation2 + $0x28] sm:$0xff]  ;;  %1463 = vmatmul.mubr.msk.bf16.gmra.mrb[8].mxu1 %vm1079_vm10, %v1035_v26 }
 0x15a   : > { %1451 = vmatmul.mubr.msk.bf16.gmra.mrb[8].mxu0 %vm1079_vm10, %v1029_v24 }
 0x1b0   : > { %v1456_v16 = vpop.f32.mrb[0].mxu1 }
 0x1b1   : > { %v1444_v15 = vpop.f32.mrb[0].mxu0  ;;  %v1198_v25 = vpop.f32.mrb[1].mxu1 }
 0x1b2   : > { %v1154_v29 = vpop.f32.mrb[1].mxu0  ;;  %v1199_v56 = vadd.f32 %v1375_v19, %v1198_v25  ;;  %v1457_v50 = vpop.f32.mrb[2].mxu1 }
 0x1b3   : > { %v1155_v49 = vadd.f32 %v1375_v19, %v1154_v29  ;;  %v1445_v30 = vpop.f32.mrb[2].mxu0  ;;  %v1209_v32 = vadd.f32 %v1457_v50, %v1375_v19  ;;  %v1201_v31 = vpop.f32.mrb[3].mxu1 }
 0x1b4   : > { %1399 = vst [vmem:[%s2421_s29 + $0x40] sm:$0xff] %v1199_v56  ;;  %v1165_v36 = vadd.f32 %v1445_v30, %v1375_v19  ;;  %v1157_v53 = vpop.f32.mrb[3].mxu0  ;;  %v1202_v55 = vadd.f32 %v1375_v19, %v1201_v31 }
 0x1b5   : > { %1241 = vst [vmem:[%s2421_s29] sm:$0xff] %v1155_v49  ;;  %1401 = vst [vmem:[%s2421_s29 + $0x50] sm:$0xff] %v1209_v32  ;;  %v1158_v35 = vadd.f32 %v1375_v19, %v1157_v53 }
 0x1b6   : > { %1393 = vst [vmem:[%s2421_s29 + $0x10] sm:$0xff] %v1165_v36  ;;  %1400 = vst [vmem:[%s2421_s29 + $0x48] sm:$0xff] %v1202_v55 }
 0x1b7   : > { %1242 = vst [vmem:[%s2421_s29 + $0x8] sm:$0xff] %v1158_v35 }
 0x1f0   : > { %v1460_v54 = vpop.f32.mrb[4].mxu1 }
 0x1f1   : > { %v1448_v59 = vpop.f32.mrb[4].mxu0  ;;  %v1221_v38 = vadd.f32 %v1460_v54, %v1375_v19  ;;  %v1213_v41 = vpop.f32.mrb[5].mxu1 }
 0x1f2   : > { %v1177_v60 = vadd.f32 %v1448_v59, %v1375_v19  ;;  %v1169_v6 = vpop.f32.mrb[5].mxu0  ;;  %v1214_v37 = vadd.f32 %v1375_v19, %v1213_v41  ;;  %v1461_v46 = vpop.f32.mrb[6].mxu1 }
 0x1f3   : > { %1403 = vst [vmem:[%s2421_s29 + $0x60] sm:$0xff] %v1221_v38  ;;  %v1170_v47 = vadd.f32 %v1375_v19, %v1169_v6  ;;  %v1449_v8 = vpop.f32.mrb[6].mxu0  ;;  %v1224_v28 = vadd.f32 %v1461_v46, %v1375_v19  ;;  %v1216_v48 = vpop.f32.mrb[7].mxu1 }
 0x1f4   : > { %1395 = vst [vmem:[%s2421_s29 + $0x20] sm:$0xff] %v1177_v60  ;;  %1402 = vst [vmem:[%s2421_s29 + $0x58] sm:$0xff] %v1214_v37  ;;  %v1180_v5 = vadd.f32 %v1449_v8, %v1375_v19  ;;  %v1172_v9 = vpop.f32.mrb[7].mxu0 }
 0x1f5   : > { %1394 = vst [vmem:[%s2421_s29 + $0x18] sm:$0xff] %v1170_v47  ;;  %1404 = vst [vmem:[%s2421_s29 + $0x68] sm:$0xff] %v1224_v28 }
 0x1f6   : > { %1396 = vst [vmem:[%s2421_s29 + $0x28] sm:$0xff] %v1180_v5 }
 0x22c   : > { %v1464_v52 = vpop.f32.mrb[8].mxu1 }
 0x22d   : > { %v1452_v63 = vpop.f32.mrb[8].mxu0  ;;  %v1236_v61 = vadd.f32 %v1464_v52, %v1375_v19  ;;  %v1228_v0 = vpop.f32.mrb[9].mxu1 }
 0x22e   : > { %v1192_v51 = vadd.f32 %v1452_v63, %v1375_v19  ;;  %v1184_v4 = vpop.f32.mrb[9].mxu0  ;;  %v1465_v12 = vpop.f32.mrb[10].mxu1 }
 0x22f   : > { %1406 = vst [vmem:[%s2421_s29 + $0x78] sm:$0xff] %v1236_v61  ;;  %v1453_v42 = vpop.f32.mrb[10].mxu0  ;;  %v1230_v14 = vpop.f32.mrb[11].mxu1 }
 0x230   : > { %1398 = vst [vmem:[%s2421_s29 + $0x38] sm:$0xff] %v1192_v51  ;;  %v1186_v57 = vpop.f32.mrb[11].mxu0  ;;  %v1231_v13 = vadd.f32 %v1375_v19, %v1230_v14 }
 0x231   : > { %v1187_v18 = vadd.f32 %v1375_v19, %v1186_v57 }
 0x232   : > { %1405 = vst [vmem:[%s2421_s29 + $0x70] sm:$0xff] %v1231_v13 }
 0x233   : > { %1397 = vst [vmem:[%s2421_s29 + $0x30] sm:$0xff] %v1187_v18 }
 0x234   : > { %1576 = shalt.err (!%p1573_p7)
}
 0x235   : > { %s1577_s20 = scalar_lea.hbm %s2443_s7, 2048  ;;  %s1581_s10 = scalar_lea.hbm %s2507_s3, 8192 }
 0x236   : > { %p1578_p9 = scmp.ne.s32.totalorder %s2443_s7, %s1577_s20  ;;  %p1582_p12 = scmp.lt.u32.totalorder %s2443_s7, %s2507_s3 }
 0x237   : > { %p1583_p13 = scmp.lt.u32.totalorder %s1581_s10, %s1577_s20  ;;  %p1585_p1 = scmp.lt.u32.totalorder %s1577_s20, %s2443_s7 }
 0x238   : > { %p1579_p10 = pnand %p1578_p9, %p1740_p3 }
 0x239   : > { %p1584_p0 = por %p1583_p13, %p1582_p12 }
 0x23a   : > { %p1580_p11 = pneg %p1579_p10 }
 0x23b   : > { %p1586_p2 = por %p1585_p1, %p1584_p0 }
 0x23d   : > { %p1587_p4 = pnand %p1586_p2, %p1580_p11 }
 0x23f   : > { %1590 = shalt.err (!%p1587_p4)
}
 0x240   : > { %s1668_s15 = smov 128  }
 0x241   : > { %1478 = dma.vmem_to_hbm [thread:$0]  (%p1740_p3), %s2445_s5, 2048, %s2443_s7, %s2451_s8, %s1668_s15, %s1668_s15, %s1659_s21  }
 0x242 PF: > { %p1484_p5 = scmp.ge.s32.totalorder %s1657_s19, 2  ;;  %s1296_s16 = sand.u32 1, %s1629_s12  }
 0x243   : > { %s1297_s9 = scalar_lea.sflag [#allocation4], %s1296_s16 }
 0x244   : > { %p1481_p6 = pnand %p1484_p5, %p1749_p8 }
 0x246   : > { %1624 = dma.done.wait (!%p1481_p6), %s1297_s9, 2048  }
 0x247   : > { %1626 = vsyncadd (!%p1481_p6), %s1297_s9, 4294965248  ;;  %s16_s19 = sadd.s32 1, %s1657_s19   ;;  %s2519_s12 = smov %s1633_s13 }
 0x248   : > { %p13_p7 = scmp.ge.s32.totalorder %s16_s19, 6   ;;  %s2520_s13 = smov %s1637_s14 }
 0x249   : > { %s2521_s14 = smov %s1758_s30  ;;  %s2522_s15 = smov %s1649_s17 }
 0x24a   : > { %s2523_s16 = smov %s1653_s18  ;;  %s2524_s17 = smov %s2527_s22 }
 0x24b   : > { %s2525_s18 = smov %s2531_s23  ;;  %15 = sbr.rel (!%p13_p7) target bundleno = 5 (0x5), region = 74 }
 0x252   :  { %1302 = vsyncpa [#allocation4], 1 }
 0x253   :  { %1304 = vsyncpa [#allocation4 + $0x1], 1 }

</bundles_post_ra>
